<compile_context>
chip_gen: v5e
topology: v5e:2x2
jax: 0.10.0
libtpu: 0.0.40
codegen_flags: <defaults>
</compile_context>

<pallas_src>
import math

import numpy as np
import jax
import jax.numpy as jnp
from jax.experimental import pallas as pl
from jax.experimental.pallas import tpu as pltpu  # noqa: F401  (TPU backend)


def _gelu_exact(x):
    # Exact (erf-based) GELU, matching torch.nn.GELU().
    # erf via Abramowitz-Stegun 7.1.26 (|abs err| < 1.5e-7); the divide goes to
    # the EUP via pl.reciprocal(approx=True) (~2e-4 rel err, inside tolerance).
    # TODO(synk): replace with lax.erf if/when erf_p lowers on Pallas TPU.
    p = 0.3275911
    a1, a2, a3, a4, a5 = (0.254829592, -0.284496736, 1.421413741,
                          -1.453152027, 1.061405429)
    z = x * 0.7071067811865476          # x / sqrt(2)
    s = jnp.where(z >= 0.0, 1.0, -1.0)
    az = jnp.abs(z)
    t = pl.reciprocal(1.0 + p * az, approx=True)
    poly = ((((a5 * t + a4) * t + a3) * t + a2) * t + a1) * t
    erf = s * (1.0 - poly * jnp.exp(-az * az))
    return 0.5 * x * (1.0 + erf)


def fno_block_kernel(x_ref, fri4_ref, w4_ref, ib4_ref, wbd_ref, postb_ref,
                     out_ref):
    in_c, out_c, _ = w4_ref.shape
    n_rows, hw = x_ref.shape              # n_rows = B*in_c + 1 (last row = ones)
    batch = (n_rows - 1) // in_c

    x = x_ref[...]                                               # (B*in_c+1, HW) f32
    xb = x.astype(jnp.bfloat16)

    # (1) truncated 2-D rfftn (norm='ortho'): ONE bf16 matmul against the fused
    #     basis [FR | FI | FR | FI]  ->  coeff = [rf | mf | rf | mf]
    coeff = jnp.dot(xb, fri4_ref[...],
                    preferred_element_type=jnp.float32)          # (B*in_c+1, 4M)

    # (2) per-mode complex channel mixing (einsum 'bikl,iokl->bokl') on the VPU:
    #     broadcast-multiply + reduce over in_c, per batch row-block.
    #     W4 = [wr | -wi | wi | wr] lines the 4 real products up with ib4.
    w4 = w4_ref[...]                                             # (in_c, out_c, 4M)
    mixed_rows = []
    for b in range(batch):
        cb = coeff[b * in_c:(b + 1) * in_c]                      # (in_c, 4M)
        mixed_rows.append(jnp.sum(cb[:, None, :] * w4, axis=0))  # (out_c, 4M)
    mixed = jnp.concatenate(mixed_rows, axis=0)                  # (B*out_c, 4M) f32

    # (3) zero-padded irfftn to (2H, 2W): real/imag halves and all 4 output
    #     quadrants fused into ONE bf16 matmul -> lane-dense (B*out_c, 4HW).
    spec = jnp.dot(mixed.astype(jnp.bfloat16), ib4_ref[...],
                   preferred_element_type=jnp.float32)           # (B*out_c, 4HW)

    # (4) per output quadrant d = dh*2+dw: ConvTranspose2d(k=2,s=2) bypass
    #     (block-diagonal over batch, bias folded in via the ones-row of x,
    #     kept in f32), exact GELU, hoisted temb projection; each chunk is
    #     written straight to a 2-lane-tile-aligned slice of out_ref so vreg
    #     pressure stays low and every store is an unmasked wide store.
    postb = postb_ref[...]                                       # (B*out_c, 1)
    for d in range(4):
        byp_d = jnp.dot(wbd_ref[d], x,
                        preferred_element_type=jnp.float32)      # (B*out_c, HW)
        pre_d = spec[:, d * hw:(d + 1) * hw] + byp_d
        out_ref[:, d * hw:(d + 1) * hw] = _gelu_exact(pre_d) + postb


def make_dft_bases(H, W, Mk, Ml):
    """Real/imag forward rfft basis (truncated to modes) and the inverse basis
    (ortho irfftn onto a zero-padded (2H, 2W) grid), quadrant-blocked."""
    h = np.arange(H)
    w = np.arange(W)
    k = np.arange(Mk)
    l = np.arange(Ml)

    # forward: x_fft[k,l] = sum_{h,w} x[h,w] * exp(-2i*pi*(kh/H + lw/W)) / sqrt(H*W)
    theta = 2.0 * np.pi * ((h[:, None, None, None] * k[None, None, :, None]) / H
                           + (w[None, :, None, None] * l[None, None, None, :]) / W)
    FR = (np.cos(theta) / math.sqrt(H * W)).reshape(H * W, Mk * Ml).astype(np.float32)
    FI = (-np.sin(theta) / math.sqrt(H * W)).reshape(H * W, Mk * Ml).astype(np.float32)

    # inverse: irfftn of the zero-padded (2H, W+1) rfft spectrum, s=(2H,2W), ortho
    #   x_spec[h', w'] = sum_{k,l} alpha_l * [Re cos(phi+psi) - Im sin(phi+psi)] / sqrt(4HW)
    #   phi = 2*pi*k*h'/(2H), psi = 2*pi*l*w'/(2W), alpha_0 = 1, alpha_{l>0} = 2
    dh = np.arange(2)
    dw = np.arange(2)
    hp = 2 * h[None, :] + dh[:, None]                  # (2, H) -> h'
    wq = 2 * w[None, :] + dw[:, None]                  # (2, W) -> w'
    phi = np.pi * k[:, None, None] * hp[None, :, :] / H    # (Mk, 2, H)
    psi = np.pi * l[:, None, None] * wq[None, :, :] / W    # (Ml, 2, W)
    ang = phi[:, None, :, None, :, None] + psi[None, :, None, :, None, :]  # (Mk,Ml,2,2,H,W)
    alpha = np.where(l > 0, 2.0, 1.0)[None, :, None, None, None, None]
    cb = alpha * np.cos(ang) / math.sqrt(4 * H * W)
    sb = alpha * np.sin(ang) / math.sqrt(4 * H * W)
    # -> (d=dh*2+dw, m=k*Ml+l, q=h*W+w)
    CB = cb.transpose(2, 3, 0, 1, 4, 5).reshape(4, Mk * Ml, H * W).astype(np.float32)
    SB = sb.transpose(2, 3, 0, 1, 4, 5).reshape(4, Mk * Ml, H * W).astype(np.float32)
    return FR, FI, CB, SB


def prepare_fno_params(w_real, w_imag, wb, bb, wp, bp, H, W, B):
    """One-off parameter prep (prep-time fusion of the DFT bases and weights)."""
    in_c, out_c, Mk, Ml = w_real.shape
    M = Mk * Ml
    HW = H * W
    FR, FI, CB, SB = make_dft_bases(H, W, Mk, Ml)

    # forward basis: real & imag fused (duplicated to line up with ib4 blocks)
    fri4 = np.concatenate([FR, FI, FR, FI], axis=1)                   # (HW, 4M)

    # inverse basis: quadrants fused into the lane dim, real/imag fused in rows
    CBc = CB.transpose(1, 0, 2).reshape(M, 4 * HW)                    # (M, 4HW)
    SBc = SB.transpose(1, 0, 2).reshape(M, 4 * HW)
    ib4 = np.concatenate([CBc, CBc, -SBc, -SBc], axis=0)              # (4M, 4HW)

    # mixing weights matching the [rf|mf|rf|mf] coefficient layout
    wr = np.asarray(w_real, np.float32).reshape(in_c, out_c, M)
    wi = np.asarray(w_imag, np.float32).reshape(in_c, out_c, M)
    w4 = np.concatenate([wr, -wi, wi, wr], axis=-1)                   # (in_c, out_c, 4M)

    # ConvTranspose2d(k=2,s=2): per output quadrant d=dh*2+dw, block-diagonal
    # over the folded batch rows, with the bias as an extra column (x carries
    # a matching all-ones last row).
    wq = np.asarray(wb, np.float32).transpose(2, 3, 1, 0).reshape(4, out_c, in_c)
    bbv = np.asarray(bb, np.float32)
    wbd = np.zeros((4, B * out_c, B * in_c + 1), np.float32)
    for d in range(4):
        for b in range(B):
            wbd[d, b * out_c:(b + 1) * out_c, b * in_c:(b + 1) * in_c] = wq[d]
        wbd[d, :, B * in_c] = np.tile(bbv, B)

    return dict(
        fri4=jnp.asarray(fri4, jnp.bfloat16),   # bf16 bases, f32 accumulation
        ib4=jnp.asarray(ib4, jnp.bfloat16),
        w4=jnp.asarray(w4),                     # channel mix stays f32 (VPU)
        wbd=jnp.asarray(wbd),                   # bypass + bias stays f32
        wp=jnp.asarray(wp, jnp.float32),        # temb projection (hoisted to wrapper)
        bp=jnp.asarray(bp, jnp.float32),
    )


def fno_block_forward(x, temb, params):
    B, in_c, H, W = x.shape
    out_c = params["w4"].shape[1]
    HW = H * W

    # folded-batch input, plus a ones-row that carries the ConvTranspose bias
    x2 = x.astype(jnp.float32).reshape(B * in_c, HW)
    x2e = jnp.concatenate([x2, jnp.ones((1, HW), jnp.float32)], axis=0)

    # hoisted TembFusion: Linear(512, out_c)(silu(temb)); added after the GELU
    te = temb.astype(jnp.float32)
    postb = (te * jax.nn.sigmoid(te)) @ params["wp"].T + params["bp"]  # (B, out_c)
    postb = postb.reshape(B * out_c, 1)

    out_q = pl.pallas_call(
        fno_block_kernel,
        out_shape=jax.ShapeDtypeStruct((B * out_c, 4 * HW), jnp.float32),
        # gridless single invocation: all operands (<1 MiB total) live in VMEM,
        # no per-step grid overhead on single-TensorCore v5e/v6e.
    )(x2e, params["fri4"], params["w4"], params["ib4"], params["wbd"], postb)

    # quadrant-blocked (b*out_c+o, (dh*2+dw)*HW + h*W + w) -> NCHW (B,out_c,2H,2W)
    out = out_q.reshape(B, out_c, 2, 2, H, W)
    out = out.transpose(0, 1, 4, 2, 5, 3).reshape(B, out_c, 2 * H, 2 * W)
    return out.astype(x.dtype)


def reference_forward(x, temb, w_real, w_imag, wb, bb, wp, bp, Mk, Ml):
    """Pure-JAX reference mirroring the PyTorch forward (uses jnp.fft)."""
    B, in_c, H, W = x.shape
    out_c = wb.shape[1]
    xf = jnp.fft.rfftn(x.astype(jnp.float32), axes=(-2, -1), norm="ortho")[:, :, :Mk, :Ml]
    weight = w_real + 1j * w_imag
    of = jnp.einsum("bikl,iokl->bokl", xf, weight)
    full = jnp.zeros((B, out_c, 2 * H, W + 1), dtype=of.dtype).at[:, :, :Mk, :Ml].set(of)
    xs = jnp.fft.irfftn(full, s=(2 * H, 2 * W), axes=(-2, -1), norm="ortho")
    byp = jnp.einsum("bihw,iokl->bohkwl", x.astype(jnp.float32), wb)
    byp = byp.reshape(B, out_c, 2 * H, 2 * W) + bb[None, :, None, None]
    out = jax.nn.gelu(xs + byp, approximate=False)
    st = temb * jax.nn.sigmoid(temb)
    proj = st @ wp.T + bp
    return (out + proj[:, :, None, None]).astype(x.dtype)


if __name__ == "__main__":
    B, in_c, out_c = 2, 4, 8
    H = W = 16
    Mk = Ml = 4                       # modes = [4, 4]

    key = jax.random.PRNGKey(0)
    ks = jax.random.split(key, 8)

    # deterministic "synthetic checkpoint"
    scale = 1.0 / (in_c * out_c)
    w_real = jax.random.normal(ks[0], (in_c, out_c, Mk, Ml), jnp.float32) * 2 * scale - scale
    w_imag = jax.random.normal(ks[1], (in_c, out_c, Mk, Ml), jnp.float32) * 2 * scale - scale
    bnd = 1.0 / math.sqrt(in_c * 2 * 2)
    wb = jax.random.uniform(ks[2], (in_c, out_c, 2, 2), jnp.float32, -bnd, bnd)   # ConvTranspose2d weight
    bb = jax.random.uniform(ks[3], (out_c,), jnp.float32, -bnd, bnd)              # ConvTranspose2d bias
    bnd2 = 1.0 / math.sqrt(512.0)
    wp = jax.random.uniform(ks[4], (out_c, 512), jnp.float32, -bnd2, bnd2)        # temb_proj weight
    bp = jax.random.uniform(ks[5], (out_c,), jnp.float32, -bnd2, bnd2)            # temb_proj bias

    x = jax.random.normal(ks[6], (B, in_c, H, W), jnp.float32)
    temb = jax.random.normal(ks[7], (B, 512), jnp.float32)

    params = prepare_fno_params(w_real, w_imag, wb, bb, wp, bp, H, W, B)

    out = jax.jit(fno_block_forward)(x, temb, params)
    out = jax.block_until_ready(out)
    assert out.shape == (B, out_c, 2 * H, 2 * W) and out.dtype == x.dtype

    ref = jax.block_until_ready(
        reference_forward(x, temb, w_real, w_imag, wb, bb, wp, bp, Mk, Ml))
    err = float(jnp.max(jnp.abs(out - ref)))
    assert err < 5e-3, f"max abs error too large: {err}"

    print("KERNEL_OK")
</pallas_src>

<mosaic_0001>
module attributes {stable_mosaic.version = 11 : i64} {
  func.func @fno_block_kernel(%arg0: memref<9x256xf32, #tpu.memory_space<vmem>>, %arg1: memref<256x64xbf16, #tpu.memory_space<vmem>>, %arg2: memref<4x8x64xf32, #tpu.memory_space<vmem>>, %arg3: memref<64x1024xbf16, #tpu.memory_space<vmem>>, %arg4: memref<4x16x9xf32, #tpu.memory_space<vmem>>, %arg5: memref<16x1xf32, #tpu.memory_space<vmem>>, %arg6: memref<16x1024xf32, #tpu.memory_space<vmem>>) attributes {dimension_semantics = [], scalar_prefetch = 0 : i64, scratch_operands = 0 : i64, tpu.core_type = #tpu.core_type<tc>} {
    %c0 = arith.constant 0 : index
    %c0_0 = arith.constant 0 : index
    %0 = vector.load %arg0[%c0, %c0_0] : memref<9x256xf32, #tpu.memory_space<vmem>>, vector<9x256xf32>
    %1 = arith.truncf %0 : vector<9x256xf32> to vector<9x256xbf16>
    %c0_1 = arith.constant 0 : index
    %c0_2 = arith.constant 0 : index
    %2 = vector.load %arg1[%c0_1, %c0_2] : memref<256x64xbf16, #tpu.memory_space<vmem>>, vector<256x64xbf16>
    %cst = arith.constant dense<0.000000e+00> : vector<9x64xf32>
    %3 = tpu.matmul %1, %2, %cst {dimension_numbers = #tpu.dot_dimension_numbers<[1], [0], [0], [1], [0, 0, 1, 1], [], []>} : vector<9x256xbf16>, vector<256x64xbf16>, vector<9x64xf32> -> vector<9x64xf32>
    %c0_3 = arith.constant 0 : index
    %c0_4 = arith.constant 0 : index
    %c0_5 = arith.constant 0 : index
    %4 = vector.load %arg2[%c0_3, %c0_4, %c0_5] : memref<4x8x64xf32, #tpu.memory_space<vmem>>, vector<4x8x64xf32>
    %5 = vector.extract_strided_slice %3 {offsets = [0, 0], sizes = [4, 64], strides = [1, 1]} : vector<9x64xf32> to vector<4x64xf32>
    %6 = vector.shape_cast %5 : vector<4x64xf32> to vector<4x1x64xf32>
    %7 = vector.broadcast %6 : vector<4x1x64xf32> to vector<4x8x64xf32>
    %8 = arith.mulf %7, %4 : vector<4x8x64xf32>
    %cst_6 = arith.constant dense<0.000000e+00> : vector<8x64xf32>
    %9 = vector.multi_reduction <add>, %8, %cst_6 [0] : vector<4x8x64xf32> to vector<8x64xf32>
    %10 = vector.extract_strided_slice %3 {offsets = [4, 0], sizes = [4, 64], strides = [1, 1]} : vector<9x64xf32> to vector<4x64xf32>
    %11 = vector.shape_cast %10 : vector<4x64xf32> to vector<4x1x64xf32>
    %12 = vector.broadcast %11 : vector<4x1x64xf32> to vector<4x8x64xf32>
    %13 = arith.mulf %12, %4 : vector<4x8x64xf32>
    %cst_7 = arith.constant dense<0.000000e+00> : vector<8x64xf32>
    %14 = vector.multi_reduction <add>, %13, %cst_7 [0] : vector<4x8x64xf32> to vector<8x64xf32>
    %15 = tpu.concatenate %9, %14 in 0 : vector<8x64xf32>, vector<8x64xf32> -> vector<16x64xf32>
    %16 = arith.truncf %15 : vector<16x64xf32> to vector<16x64xbf16>
    %c0_8 = arith.constant 0 : index
    %c0_9 = arith.constant 0 : index
    %17 = vector.load %arg3[%c0_8, %c0_9] : memref<64x1024xbf16, #tpu.memory_space<vmem>>, vector<64x1024xbf16>
    %cst_10 = arith.constant dense<0.000000e+00> : vector<16x1024xf32>
    %18 = tpu.matmul %16, %17, %cst_10 {dimension_numbers = #tpu.dot_dimension_numbers<[1], [0], [0], [1], [0, 0, 1, 1], [], []>} : vector<16x64xbf16>, vector<64x1024xbf16>, vector<16x1024xf32> -> vector<16x1024xf32>
    %c0_11 = arith.constant 0 : index
    %c0_12 = arith.constant 0 : index
    %19 = vector.load %arg5[%c0_11, %c0_12] : memref<16x1xf32, #tpu.memory_space<vmem>>, vector<16x1xf32>
    %c0_13 = arith.constant 0 : index
    %c0_14 = arith.constant 0 : index
    %c0_15 = arith.constant 0 : index
    %20 = vector.load %arg4[%c0_13, %c0_14, %c0_15] : memref<4x16x9xf32, #tpu.memory_space<vmem>>, vector<1x16x9xf32>
    %21 = vector.shape_cast %20 : vector<1x16x9xf32> to vector<16x9xf32>
    %cst_16 = arith.constant dense<0.000000e+00> : vector<16x256xf32>
    %22 = tpu.matmul %21, %0, %cst_16 {dimension_numbers = #tpu.dot_dimension_numbers<[1], [0], [0], [1], [0, 0, 1, 1], [], []>} : vector<16x9xf32>, vector<9x256xf32>, vector<16x256xf32> -> vector<16x256xf32>
    %23 = vector.extract_strided_slice %18 {offsets = [0, 0], sizes = [16, 256], strides = [1, 1]} : vector<16x1024xf32> to vector<16x256xf32>
    %24 = arith.addf %23, %22 : vector<16x256xf32>
    %cst_17 = arith.constant 0.707106769 : f32
    %25 = vector.broadcast %cst_17 : f32 to vector<16x256xf32>
    %26 = arith.mulf %24, %25 : vector<16x256xf32>
    %cst_18 = arith.constant 0.000000e+00 : f32
    %27 = vector.broadcast %cst_18 : f32 to vector<16x256xf32>
    %28 = arith.cmpf oge, %26, %27 : vector<16x256xf32>
    %cst_19 = arith.constant 1.000000e+00 : f32
    %cst_20 = arith.constant -1.000000e+00 : f32
    %29 = vector.broadcast %cst_19 : f32 to vector<16x256xf32>
    %30 = vector.broadcast %cst_20 : f32 to vector<16x256xf32>
    %31 = arith.select %28, %29, %30 : vector<16x256xi1>, vector<16x256xf32>
    %32 = math.absf %26 : vector<16x256xf32>
    %cst_21 = arith.constant 0.327591091 : f32
    %33 = vector.broadcast %cst_21 : f32 to vector<16x256xf32>
    %34 = arith.mulf %33, %32 : vector<16x256xf32>
    %cst_22 = arith.constant 1.000000e+00 : f32
    %35 = vector.broadcast %cst_22 : f32 to vector<16x256xf32>
    %36 = arith.addf %35, %34 : vector<16x256xf32>
    %37 = tpu.reciprocal %36 {approx = true} : vector<16x256xf32> -> vector<16x256xf32>
    %cst_23 = arith.constant 1.06140542 : f32
    %38 = vector.broadcast %cst_23 : f32 to vector<16x256xf32>
    %39 = arith.mulf %38, %37 : vector<16x256xf32>
    %cst_24 = arith.constant -1.45315206 : f32
    %40 = vector.broadcast %cst_24 : f32 to vector<16x256xf32>
    %41 = arith.addf %39, %40 : vector<16x256xf32>
    %42 = arith.mulf %41, %37 : vector<16x256xf32>
    %cst_25 = arith.constant 1.42141378 : f32
    %43 = vector.broadcast %cst_25 : f32 to vector<16x256xf32>
    %44 = arith.addf %42, %43 : vector<16x256xf32>
    %45 = arith.mulf %44, %37 : vector<16x256xf32>
    %cst_26 = arith.constant -0.284496725 : f32
    %46 = vector.broadcast %cst_26 : f32 to vector<16x256xf32>
    %47 = arith.addf %45, %46 : vector<16x256xf32>
    %48 = arith.mulf %47, %37 : vector<16x256xf32>
    %cst_27 = arith.constant 0.254829586 : f32
    %49 = vector.broadcast %cst_27 : f32 to vector<16x256xf32>
    %50 = arith.addf %48, %49 : vector<16x256xf32>
    %51 = arith.mulf %50, %37 : vector<16x256xf32>
    %cst_28 = arith.constant 0.000000e+00 : f32
    %52 = vector.broadcast %cst_28 : f32 to vector<16x256xf32>
    %53 = arith.subf %52, %32 : vector<16x256xf32>
    %54 = arith.mulf %53, %32 : vector<16x256xf32>
    %55 = math.exp %54 : vector<16x256xf32>
    %56 = arith.mulf %51, %55 : vector<16x256xf32>
    %cst_29 = arith.constant 1.000000e+00 : f32
    %57 = vector.broadcast %cst_29 : f32 to vector<16x256xf32>
    %58 = arith.subf %57, %56 : vector<16x256xf32>
    %59 = arith.mulf %31, %58 : vector<16x256xf32>
    %cst_30 = arith.constant 5.000000e-01 : f32
    %60 = vector.broadcast %cst_30 : f32 to vector<16x256xf32>
    %61 = arith.mulf %60, %24 : vector<16x256xf32>
    %cst_31 = arith.constant 1.000000e+00 : f32
    %62 = vector.broadcast %cst_31 : f32 to vector<16x256xf32>
    %63 = arith.addf %62, %59 : vector<16x256xf32>
    %64 = arith.mulf %61, %63 : vector<16x256xf32>
    %65 = vector.broadcast %19 : vector<16x1xf32> to vector<16x256xf32>
    %66 = arith.addf %64, %65 : vector<16x256xf32>
    %c0_32 = arith.constant 0 : index
    %c0_33 = arith.constant 0 : index
    %67 = vector.load %arg6[%c0_32, %c0_33] : memref<16x1024xf32, #tpu.memory_space<vmem>>, vector<16x256xf32>
    tpu.vector_store %arg6[%c0_32, %c0_33], %66 {strides = array<i32>} : memref<16x1024xf32, #tpu.memory_space<vmem>>, vector<16x256xf32>,
    %c1 = arith.constant 1 : index
    %c0_34 = arith.constant 0 : index
    %c0_35 = arith.constant 0 : index
    %68 = vector.load %arg4[%c1, %c0_34, %c0_35] : memref<4x16x9xf32, #tpu.memory_space<vmem>>, vector<1x16x9xf32>
    %69 = vector.shape_cast %68 : vector<1x16x9xf32> to vector<16x9xf32>
    %cst_36 = arith.constant dense<0.000000e+00> : vector<16x256xf32>
    %70 = tpu.matmul %69, %0, %cst_36 {dimension_numbers = #tpu.dot_dimension_numbers<[1], [0], [0], [1], [0, 0, 1, 1], [], []>} : vector<16x9xf32>, vector<9x256xf32>, vector<16x256xf32> -> vector<16x256xf32>
    %71 = vector.extract_strided_slice %18 {offsets = [0, 256], sizes = [16, 256], strides = [1, 1]} : vector<16x1024xf32> to vector<16x256xf32>
    %72 = arith.addf %71, %70 : vector<16x256xf32>
    %cst_37 = arith.constant 0.707106769 : f32
    %73 = vector.broadcast %cst_37 : f32 to vector<16x256xf32>
    %74 = arith.mulf %72, %73 : vector<16x256xf32>
    %cst_38 = arith.constant 0.000000e+00 : f32
    %75 = vector.broadcast %cst_38 : f32 to vector<16x256xf32>
    %76 = arith.cmpf oge, %74, %75 : vector<16x256xf32>
    %cst_39 = arith.constant 1.000000e+00 : f32
    %cst_40 = arith.constant -1.000000e+00 : f32
    %77 = vector.broadcast %cst_39 : f32 to vector<16x256xf32>
    %78 = vector.broadcast %cst_40 : f32 to vector<16x256xf32>
    %79 = arith.select %76, %77, %78 : vector<16x256xi1>, vector<16x256xf32>
    %80 = math.absf %74 : vector<16x256xf32>
    %cst_41 = arith.constant 0.327591091 : f32
    %81 = vector.broadcast %cst_41 : f32 to vector<16x256xf32>
    %82 = arith.mulf %81, %80 : vector<16x256xf32>
    %cst_42 = arith.constant 1.000000e+00 : f32
    %83 = vector.broadcast %cst_42 : f32 to vector<16x256xf32>
    %84 = arith.addf %83, %82 : vector<16x256xf32>
    %85 = tpu.reciprocal %84 {approx = true} : vector<16x256xf32> -> vector<16x256xf32>
    %cst_43 = arith.constant 1.06140542 : f32
    %86 = vector.broadcast %cst_43 : f32 to vector<16x256xf32>
    %87 = arith.mulf %86, %85 : vector<16x256xf32>
    %cst_44 = arith.constant -1.45315206 : f32
    %88 = vector.broadcast %cst_44 : f32 to vector<16x256xf32>
    %89 = arith.addf %87, %88 : vector<16x256xf32>
    %90 = arith.mulf %89, %85 : vector<16x256xf32>
    %cst_45 = arith.constant 1.42141378 : f32
    %91 = vector.broadcast %cst_45 : f32 to vector<16x256xf32>
    %92 = arith.addf %90, %91 : vector<16x256xf32>
    %93 = arith.mulf %92, %85 : vector<16x256xf32>
    %cst_46 = arith.constant -0.284496725 : f32
    %94 = vector.broadcast %cst_46 : f32 to vector<16x256xf32>
    %95 = arith.addf %93, %94 : vector<16x256xf32>
    %96 = arith.mulf %95, %85 : vector<16x256xf32>
    %cst_47 = arith.constant 0.254829586 : f32
    %97 = vector.broadcast %cst_47 : f32 to vector<16x256xf32>
    %98 = arith.addf %96, %97 : vector<16x256xf32>
    %99 = arith.mulf %98, %85 : vector<16x256xf32>
    %cst_48 = arith.constant 0.000000e+00 : f32
    %100 = vector.broadcast %cst_48 : f32 to vector<16x256xf32>
    %101 = arith.subf %100, %80 : vector<16x256xf32>
    %102 = arith.mulf %101, %80 : vector<16x256xf32>
    %103 = math.exp %102 : vector<16x256xf32>
    %104 = arith.mulf %99, %103 : vector<16x256xf32>
    %cst_49 = arith.constant 1.000000e+00 : f32
    %105 = vector.broadcast %cst_49 : f32 to vector<16x256xf32>
    %106 = arith.subf %105, %104 : vector<16x256xf32>
    %107 = arith.mulf %79, %106 : vector<16x256xf32>
    %cst_50 = arith.constant 5.000000e-01 : f32
    %108 = vector.broadcast %cst_50 : f32 to vector<16x256xf32>
    %109 = arith.mulf %108, %72 : vector<16x256xf32>
    %cst_51 = arith.constant 1.000000e+00 : f32
    %110 = vector.broadcast %cst_51 : f32 to vector<16x256xf32>
    %111 = arith.addf %110, %107 : vector<16x256xf32>
    %112 = arith.mulf %109, %111 : vector<16x256xf32>
    %113 = vector.broadcast %19 : vector<16x1xf32> to vector<16x256xf32>
    %114 = arith.addf %112, %113 : vector<16x256xf32>
    %c0_52 = arith.constant 0 : index
    %c256 = arith.constant 256 : index
    %115 = vector.load %arg6[%c0_52, %c256] : memref<16x1024xf32, #tpu.memory_space<vmem>>, vector<16x256xf32>
    tpu.vector_store %arg6[%c0_52, %c256], %114 {strides = array<i32>} : memref<16x1024xf32, #tpu.memory_space<vmem>>, vector<16x256xf32>,
    %c2 = arith.constant 2 : index
    %c0_53 = arith.constant 0 : index
    %c0_54 = arith.constant 0 : index
    %116 = vector.load %arg4[%c2, %c0_53, %c0_54] : memref<4x16x9xf32, #tpu.memory_space<vmem>>, vector<1x16x9xf32>
    %117 = vector.shape_cast %116 : vector<1x16x9xf32> to vector<16x9xf32>
    %cst_55 = arith.constant dense<0.000000e+00> : vector<16x256xf32>
    %118 = tpu.matmul %117, %0, %cst_55 {dimension_numbers = #tpu.dot_dimension_numbers<[1], [0], [0], [1], [0, 0, 1, 1], [], []>} : vector<16x9xf32>, vector<9x256xf32>, vector<16x256xf32> -> vector<16x256xf32>
    %119 = vector.extract_strided_slice %18 {offsets = [0, 512], sizes = [16, 256], strides = [1, 1]} : vector<16x1024xf32> to vector<16x256xf32>
    %120 = arith.addf %119, %118 : vector<16x256xf32>
    %cst_56 = arith.constant 0.707106769 : f32
    %121 = vector.broadcast %cst_56 : f32 to vector<16x256xf32>
    %122 = arith.mulf %120, %121 : vector<16x256xf32>
    %cst_57 = arith.constant 0.000000e+00 : f32
    %123 = vector.broadcast %cst_57 : f32 to vector<16x256xf32>
    %124 = arith.cmpf oge, %122, %123 : vector<16x256xf32>
    %cst_58 = arith.constant 1.000000e+00 : f32
    %cst_59 = arith.constant -1.000000e+00 : f32
    %125 = vector.broadcast %cst_58 : f32 to vector<16x256xf32>
    %126 = vector.broadcast %cst_59 : f32 to vector<16x256xf32>
    %127 = arith.select %124, %125, %126 : vector<16x256xi1>, vector<16x256xf32>
    %128 = math.absf %122 : vector<16x256xf32>
    %cst_60 = arith.constant 0.327591091 : f32
    %129 = vector.broadcast %cst_60 : f32 to vector<16x256xf32>
    %130 = arith.mulf %129, %128 : vector<16x256xf32>
    %cst_61 = arith.constant 1.000000e+00 : f32
    %131 = vector.broadcast %cst_61 : f32 to vector<16x256xf32>
    %132 = arith.addf %131, %130 : vector<16x256xf32>
    %133 = tpu.reciprocal %132 {approx = true} : vector<16x256xf32> -> vector<16x256xf32>
    %cst_62 = arith.constant 1.06140542 : f32
    %134 = vector.broadcast %cst_62 : f32 to vector<16x256xf32>
    %135 = arith.mulf %134, %133 : vector<16x256xf32>
    %cst_63 = arith.constant -1.45315206 : f32
    %136 = vector.broadcast %cst_63 : f32 to vector<16x256xf32>
    %137 = arith.addf %135, %136 : vector<16x256xf32>
    %138 = arith.mulf %137, %133 : vector<16x256xf32>
    %cst_64 = arith.constant 1.42141378 : f32
    %139 = vector.broadcast %cst_64 : f32 to vector<16x256xf32>
    %140 = arith.addf %138, %139 : vector<16x256xf32>
    %141 = arith.mulf %140, %133 : vector<16x256xf32>
    %cst_65 = arith.constant -0.284496725 : f32
    %142 = vector.broadcast %cst_65 : f32 to vector<16x256xf32>
    %143 = arith.addf %141, %142 : vector<16x256xf32>
    %144 = arith.mulf %143, %133 : vector<16x256xf32>
    %cst_66 = arith.constant 0.254829586 : f32
    %145 = vector.broadcast %cst_66 : f32 to vector<16x256xf32>
    %146 = arith.addf %144, %145 : vector<16x256xf32>
    %147 = arith.mulf %146, %133 : vector<16x256xf32>
    %cst_67 = arith.constant 0.000000e+00 : f32
    %148 = vector.broadcast %cst_67 : f32 to vector<16x256xf32>
    %149 = arith.subf %148, %128 : vector<16x256xf32>
    %150 = arith.mulf %149, %128 : vector<16x256xf32>
    %151 = math.exp %150 : vector<16x256xf32>
    %152 = arith.mulf %147, %151 : vector<16x256xf32>
    %cst_68 = arith.constant 1.000000e+00 : f32
    %153 = vector.broadcast %cst_68 : f32 to vector<16x256xf32>
    %154 = arith.subf %153, %152 : vector<16x256xf32>
    %155 = arith.mulf %127, %154 : vector<16x256xf32>
    %cst_69 = arith.constant 5.000000e-01 : f32
    %156 = vector.broadcast %cst_69 : f32 to vector<16x256xf32>
    %157 = arith.mulf %156, %120 : vector<16x256xf32>
    %cst_70 = arith.constant 1.000000e+00 : f32
    %158 = vector.broadcast %cst_70 : f32 to vector<16x256xf32>
    %159 = arith.addf %158, %155 : vector<16x256xf32>
    %160 = arith.mulf %157, %159 : vector<16x256xf32>
    %161 = vector.broadcast %19 : vector<16x1xf32> to vector<16x256xf32>
    %162 = arith.addf %160, %161 : vector<16x256xf32>
    %c0_71 = arith.constant 0 : index
    %c512 = arith.constant 512 : index
    %163 = vector.load %arg6[%c0_71, %c512] : memref<16x1024xf32, #tpu.memory_space<vmem>>, vector<16x256xf32>
    tpu.vector_store %arg6[%c0_71, %c512], %162 {strides = array<i32>} : memref<16x1024xf32, #tpu.memory_space<vmem>>, vector<16x256xf32>,
    %c3 = arith.constant 3 : index
    %c0_72 = arith.constant 0 : index
    %c0_73 = arith.constant 0 : index
    %164 = vector.load %arg4[%c3, %c0_72, %c0_73] : memref<4x16x9xf32, #tpu.memory_space<vmem>>, vector<1x16x9xf32>
    %165 = vector.shape_cast %164 : vector<1x16x9xf32> to vector<16x9xf32>
    %cst_74 = arith.constant dense<0.000000e+00> : vector<16x256xf32>
    %166 = tpu.matmul %165, %0, %cst_74 {dimension_numbers = #tpu.dot_dimension_numbers<[1], [0], [0], [1], [0, 0, 1, 1], [], []>} : vector<16x9xf32>, vector<9x256xf32>, vector<16x256xf32> -> vector<16x256xf32>
    %167 = vector.extract_strided_slice %18 {offsets = [0, 768], sizes = [16, 256], strides = [1, 1]} : vector<16x1024xf32> to vector<16x256xf32>
    %168 = arith.addf %167, %166 : vector<16x256xf32>
    %cst_75 = arith.constant 0.707106769 : f32
    %169 = vector.broadcast %cst_75 : f32 to vector<16x256xf32>
    %170 = arith.mulf %168, %169 : vector<16x256xf32>
    %cst_76 = arith.constant 0.000000e+00 : f32
    %171 = vector.broadcast %cst_76 : f32 to vector<16x256xf32>
    %172 = arith.cmpf oge, %170, %171 : vector<16x256xf32>
    %cst_77 = arith.constant 1.000000e+00 : f32
    %cst_78 = arith.constant -1.000000e+00 : f32
    %173 = vector.broadcast %cst_77 : f32 to vector<16x256xf32>
    %174 = vector.broadcast %cst_78 : f32 to vector<16x256xf32>
    %175 = arith.select %172, %173, %174 : vector<16x256xi1>, vector<16x256xf32>
    %176 = math.absf %170 : vector<16x256xf32>
    %cst_79 = arith.constant 0.327591091 : f32
    %177 = vector.broadcast %cst_79 : f32 to vector<16x256xf32>
    %178 = arith.mulf %177, %176 : vector<16x256xf32>
    %cst_80 = arith.constant 1.000000e+00 : f32
    %179 = vector.broadcast %cst_80 : f32 to vector<16x256xf32>
    %180 = arith.addf %179, %178 : vector<16x256xf32>
    %181 = tpu.reciprocal %180 {approx = true} : vector<16x256xf32> -> vector<16x256xf32>
    %cst_81 = arith.constant 1.06140542 : f32
    %182 = vector.broadcast %cst_81 : f32 to vector<16x256xf32>
    %183 = arith.mulf %182, %181 : vector<16x256xf32>
    %cst_82 = arith.constant -1.45315206 : f32
    %184 = vector.broadcast %cst_82 : f32 to vector<16x256xf32>
    %185 = arith.addf %183, %184 : vector<16x256xf32>
    %186 = arith.mulf %185, %181 : vector<16x256xf32>
    %cst_83 = arith.constant 1.42141378 : f32
    %187 = vector.broadcast %cst_83 : f32 to vector<16x256xf32>
    %188 = arith.addf %186, %187 : vector<16x256xf32>
    %189 = arith.mulf %188, %181 : vector<16x256xf32>
    %cst_84 = arith.constant -0.284496725 : f32
    %190 = vector.broadcast %cst_84 : f32 to vector<16x256xf32>
    %191 = arith.addf %189, %190 : vector<16x256xf32>
    %192 = arith.mulf %191, %181 : vector<16x256xf32>
    %cst_85 = arith.constant 0.254829586 : f32
    %193 = vector.broadcast %cst_85 : f32 to vector<16x256xf32>
    %194 = arith.addf %192, %193 : vector<16x256xf32>
    %195 = arith.mulf %194, %181 : vector<16x256xf32>
    %cst_86 = arith.constant 0.000000e+00 : f32
    %196 = vector.broadcast %cst_86 : f32 to vector<16x256xf32>
    %197 = arith.subf %196, %176 : vector<16x256xf32>
    %198 = arith.mulf %197, %176 : vector<16x256xf32>
    %199 = math.exp %198 : vector<16x256xf32>
    %200 = arith.mulf %195, %199 : vector<16x256xf32>
    %cst_87 = arith.constant 1.000000e+00 : f32
    %201 = vector.broadcast %cst_87 : f32 to vector<16x256xf32>
    %202 = arith.subf %201, %200 : vector<16x256xf32>
    %203 = arith.mulf %175, %202 : vector<16x256xf32>
    %cst_88 = arith.constant 5.000000e-01 : f32
    %204 = vector.broadcast %cst_88 : f32 to vector<16x256xf32>
    %205 = arith.mulf %204, %168 : vector<16x256xf32>
    %cst_89 = arith.constant 1.000000e+00 : f32
    %206 = vector.broadcast %cst_89 : f32 to vector<16x256xf32>
    %207 = arith.addf %206, %203 : vector<16x256xf32>
    %208 = arith.mulf %205, %207 : vector<16x256xf32>
    %209 = vector.broadcast %19 : vector<16x1xf32> to vector<16x256xf32>
    %210 = arith.addf %208, %209 : vector<16x256xf32>
    %c0_90 = arith.constant 0 : index
    %c768 = arith.constant 768 : index
    %211 = vector.load %arg6[%c0_90, %c768] : memref<16x1024xf32, #tpu.memory_space<vmem>>, vector<16x256xf32>
    tpu.vector_store %arg6[%c0_90, %c768], %210 {strides = array<i32>} : memref<16x1024xf32, #tpu.memory_space<vmem>>, vector<16x256xf32>,
    return
  }
}

</mosaic_0001>

<bundles_post_ra>
// kernel: fno_block_forward.1
= control target key start
LH: loop header
LB: loop body
LE: loop exit
PB: predicated region body
PF: predicated region fallthrough
CT: control target
= control target key end

     0   :  { %vm559_vm0 = vcmask 1040384   ;;  %vm204_vm1 = vcmask 523264   ;;  %vm552_vm2 = vcmask 72704   ;;  %s2424_s1 = inlined_call_operand.vmem [shape: bf16[256,64], index: 1, kind: input, shape index: {}]   ;;  %s2425_s0 = inlined_call_operand.vmem [shape: f32[9,256], index: 0, kind: input, shape index: {}]   ;;  %s2426_s3 = inlined_call_operand.vmem [shape: bf16[64,1024], index: 3, kind: input, shape index: {}]   ;;  %s2427_s2 = inlined_call_operand.vmem [shape: f32[4,8,64], index: 2, kind: input, shape index: {}]   ;;  %s2428_s4 = inlined_call_operand.vmem [shape: f32[4,16,9], index: 4, kind: input, shape index: {}]   ;;  %s2429_s5 = inlined_call_operand.vmem [shape: f32[16,1], index: 5, kind: input, shape index: {}]   ;;  %s2430_s6 = inlined_call_operand.vmem [shape: f32[16,1024], index: 6, kind: output, shape index: {}]  }
   0x1   :  { %v1492_v0 = vld [vmem:[%s2424_s1 + $0x38] sm:$0xff]  ;;  %v1491_v2 = vld [vmem:[%s2424_s1 + $0x30] sm:$0xff]  ;;  %v1490_v4 = vld [vmem:[%s2424_s1 + $0x28] sm:$0xff] }
   0x2   :  { %v1500_v1 = vld [vmem:[%s2424_s1 + $0x78] sm:$0xff]  ;;  %158 = vmatpush.bf16.msra.mxu0 %v1492_v0  ;;  %v1499_v3 = vld [vmem:[%s2424_s1 + $0x70] sm:$0xff]  ;;  %v1498_v5 = vld [vmem:[%s2424_s1 + $0x68] sm:$0xff] }
   0x3   :  { %171 = vmatpush.bf16.msra.mxu1 %v1500_v1  ;;  %v1489_v6 = vld [vmem:[%s2424_s1 + $0x20] sm:$0xff]  ;;  %v1488_v8 = vld [vmem:[%s2424_s1 + $0x18] sm:$0xff]  ;;  %v1487_v10 = vld [vmem:[%s2424_s1 + $0x10] sm:$0xff] }
   0x4   :  { %v1497_v7 = vld [vmem:[%s2424_s1 + $0x60] sm:$0xff]  ;;  %v1496_v9 = vld [vmem:[%s2424_s1 + $0x58] sm:$0xff]  ;;  %v1495_v11 = vld [vmem:[%s2424_s1 + $0x50] sm:$0xff] }
   0x5   :  { %v1486_v12 = vld [vmem:[%s2424_s1 + $0x8] sm:$0xff]  ;;  %v1485_v14 = vld [vmem:[%s2424_s1] sm:$0xff]  ;;  %v1693_v17 = vld [vmem:[%s2425_s0 + $0x10] sm:$0x1] }
   0x6   :  { %159 = vmatpush.bf16.msra.mxu0 %v1491_v2  ;;  %v1494_v13 = vld [vmem:[%s2424_s1 + $0x48] sm:$0xff]  ;;  %v1493_v15 = vld [vmem:[%s2424_s1 + $0x40] sm:$0xff]  ;;  %v1703_v19 = vld [vmem:[%s2425_s0 + $0x18] sm:$0x1] }
   0x7   :  { %172 = vmatpush.bf16.msra.mxu1 %v1499_v3  ;;  %v1688_v16 = vld [vmem:[%s2425_s0] sm:$0xff]  ;;  %v1698_v18 = vld [vmem:[%s2425_s0 + $0x8] sm:$0xff]  ;;  %v1433_v27 = vld [vmem:[%s2426_s3 + $0xd0] sm:$0xf] }
   0x8   :  { %v28_v20 = vpack.c.bf16 %v1693_v17, %v1688_v16  ;;  %v29_v21 = vpack.c.bf16 %v1703_v19, %v1698_v18  ;;  %v1417_v22 = vld [vmem:[%s2426_s3 + $0xc0] sm:$0xf]  ;;  %v1525_v24 = vld [vmem:[%s2426_s3 + $0xc4] sm:$0xf]  ;;  %v1531_v28 = vld [vmem:[%s2426_s3 + $0xec] sm:$0xf0] }
   0x9   :  { %v1529_v23 = vld [vmem:[%s2426_s3 + $0xdc] sm:$0xf0]  ;;  %v1419_v26 = vld [vmem:[%s2426_s3 + $0xe0] sm:$0xf0]  ;;  %v1434_v30 = vor.u32 %v1531_v28, %v1433_v27  ;;  %v1527_v31 = vld [vmem:[%s2426_s3 + $0xd4] sm:$0xf] }
   0xa   :  { %160 = vmatpush.bf16.msra.mxu0 %v1490_v4  ;;  %v1418_v25 = vor.u32 %v1529_v23, %v1417_v22  ;;  %v1422_v29 = vor.u32 %v1525_v24, %v1419_v26  ;;  %v1435_v32 = vld [vmem:[%s2426_s3 + $0xf0] sm:$0xf0]  ;;  %v1385_v34 = vld [vmem:[%s2426_s3 + $0x80] sm:$0xf]  ;;  %v1517_v36 = vld [vmem:[%s2426_s3 + $0x84] sm:$0xf] }
   0xb   :  { %173 = vmatpush.bf16.msra.mxu1 %v1498_v5  ;;  %v1438_v33 = vor.u32 %v1527_v31, %v1435_v32  ;;  %v1521_v35 = vld [vmem:[%s2426_s3 + $0x9c] sm:$0xf0]  ;;  %v1387_v38 = vld [vmem:[%s2426_s3 + $0xa0] sm:$0xf0]  ;;  %v1401_v39 = vld [vmem:[%s2426_s3 + $0x90] sm:$0xf] }
   0xc   :  { %440 = vmatpush.bf16.msra.mxu2 %v1418_v25  ;;  %454 = vmatpush.bf16.msra.mxu3 %v1422_v29  ;;  %v1386_v37 = vor.u32 %v1521_v35, %v1385_v34  ;;  %v1523_v40 = vld [vmem:[%s2426_s3 + $0xac] sm:$0xf0]  ;;  %v1390_v41 = vor.u32 %v1517_v36, %v1387_v38  ;;  %v1519_v43 = vld [vmem:[%s2426_s3 + $0x94] sm:$0xf]  ;;  %v1353_v46 = vld [vmem:[%s2426_s3 + $0x40] sm:$0xf] }
   0xd   :  { %v1402_v42 = vor.u32 %v1523_v40, %v1401_v39  ;;  %v1403_v44 = vld [vmem:[%s2426_s3 + $0xb0] sm:$0xf0]  ;;  %v1513_v47 = vld [vmem:[%s2426_s3 + $0x5c] sm:$0xf0]  ;;  %v1509_v48 = vld [vmem:[%s2426_s3 + $0x44] sm:$0xf] }
   0xe   :  { %161 = vmatpush.bf16.msra.mxu0 %v1489_v6  ;;  %v1406_v45 = vor.u32 %v1519_v43, %v1403_v44  ;;  %v1354_v49 = vor.u32 %v1513_v47, %v1353_v46  ;;  %v1355_v50 = vld [vmem:[%s2426_s3 + $0x60] sm:$0xf0]  ;;  %v1369_v51 = vld [vmem:[%s2426_s3 + $0x50] sm:$0xf]  ;;  %v1511_v55 = vld [vmem:[%s2426_s3 + $0x54] sm:$0xf] }
   0xf   :  { %174 = vmatpush.bf16.msra.mxu1 %v1497_v7  ;;  %v1515_v52 = vld [vmem:[%s2426_s3 + $0x6c] sm:$0xf0]  ;;  %v1358_v53 = vor.u32 %v1509_v48, %v1355_v50  ;;  %v1371_v56 = vld [vmem:[%s2426_s3 + $0x70] sm:$0xf0]  ;;  %v1321_v58 = vld [vmem:[%s2426_s3] sm:$0xf] }
  0x10   :  { %441 = vmatpush.bf16.msra.mxu2 %v1386_v37  ;;  %455 = vmatpush.bf16.msra.mxu3 %v1390_v41  ;;  %v1370_v54 = vor.u32 %v1515_v52, %v1369_v51  ;;  %v1374_v57 = vor.u32 %v1511_v55, %v1371_v56  ;;  %v1505_v59 = vld [vmem:[%s2426_s3 + $0x1c] sm:$0xf0]  ;;  %v1501_v60 = vld [vmem:[%s2426_s3 + $0x4] sm:$0xf]  ;;  %v1337_v63 = vld [vmem:[%s2426_s3 + $0x10] sm:$0xf] }
  0x11   :  { %v1322_v61 = vor.u32 %v1505_v59, %v1321_v58  ;;  %v1323_v62 = vld [vmem:[%s2426_s3 + $0x20] sm:$0xf0]  ;;  %v1507_v0 = vld [vmem:[%s2426_s3 + $0x2c] sm:$0xf0]  ;;  %v1503_v3 = vld [vmem:[%s2426_s3 + $0x14] sm:$0xf] }
  0x12   :  { %162 = vmatpush.bf16.msra.mxu0 %v1488_v8  ;;  %v1326_v1 = vor.u32 %v1501_v60, %v1323_v62  ;;  %v1338_v2 = vor.u32 %v1507_v0, %v1337_v63  ;;  %v1339_v4 = vld [vmem:[%s2426_s3 + $0x30] sm:$0xf0]  ;;  %v1425_v6 = vld [vmem:[%s2426_s3 + $0xc8] sm:$0xf]  ;;  %v1526_v8 = vld [vmem:[%s2426_s3 + $0xcc] sm:$0xf] }
  0x13   :  { %175 = vmatpush.bf16.msra.mxu1 %v1496_v9  ;;  %v1342_v5 = vor.u32 %v1503_v3, %v1339_v4  ;;  %v1530_v7 = vld [vmem:[%s2426_s3 + $0xe4] sm:$0xf0]  ;;  %v1510_v24 = vld [vmem:[%s2426_s3 + $0x4c] sm:$0xf]  ;;  %v184_v40 = vld [vmem:[%s2427_s2] sm:$0xff] }
  0x14   :  { %442 = vmatpush.bf16.msra.mxu2 %v1354_v49  ;;  %456 = vmatpush.bf16.msra.mxu3 %v1358_v53  ;;  %v1426_v9 = vor.u32 %v1530_v7, %v1425_v6  ;;  %v1361_v22 = vld [vmem:[%s2426_s3 + $0x48] sm:$0xf]  ;;  %v1363_v25 = vld [vmem:[%s2426_s3 + $0x68] sm:$0xf0]  ;;  %v187_v50 = vld [vmem:[%s2427_s2 + $0x18] sm:$0xff] }
  0x15   :  { %v1514_v23 = vld [vmem:[%s2426_s3 + $0x64] sm:$0xf0]  ;;  %v1366_v27 = vor.u32 %v1510_v24, %v1363_v25  ;;  %v1502_v32 = vld [vmem:[%s2426_s3 + $0xc] sm:$0xf] }
  0x16   :  { %163 = vmatpush.bf16.msra.mxu0 %v1487_v10  ;;  %v1427_v10 = vld [vmem:[%s2426_s3 + $0xe8] sm:$0xf0]  ;;  %v1362_v26 = vor.u32 %v1514_v23, %v1361_v22  ;;  %v1329_v28 = vld [vmem:[%s2426_s3 + $0x8] sm:$0xf] }
  0x17   :  { %176 = vmatpush.bf16.msra.mxu1 %v1495_v11  ;;  %v1430_v11 = vor.u32 %v1526_v8, %v1427_v10  ;;  %v1506_v29 = vld [vmem:[%s2426_s3 + $0x24] sm:$0xf0] }
  0x18   :  { %443 = vmatpush.bf16.msra.mxu2 %v1322_v61  ;;  %457 = vmatpush.bf16.msra.mxu3 %v1326_v1  ;;  %v1330_v35 = vor.u32 %v1506_v29, %v1329_v28  ;;  %v185_v41 = vld [vmem:[%s2427_s2 + $0x8] sm:$0xff]  ;;  %v1524_v28 = vld [vmem:[%s2426_s3 + $0xb4] sm:$0xf0]  ;;  %v1520_v29 = vld [vmem:[%s2426_s3 + $0x9c] sm:$0xf] }
  0x1a   :  { %164 = vmatpush.bf16.msra.mxu0 %v1486_v12  ;;  %v1393_v12 = vld [vmem:[%s2426_s3 + $0x88] sm:$0xf] }
  0x1b   :  { %177 = vmatpush.bf16.msra.mxu1 %v1494_v13  ;;  %v1522_v13 = vld [vmem:[%s2426_s3 + $0xa4] sm:$0xf0] }
  0x1c   :  { %468 = vmatpush.bf16.msrb.mxu2 %v1426_v9  ;;  %482 = vmatpush.bf16.msrb.mxu3 %v1430_v11 }
  0x1e   :  { %165 = vmatpush.bf16.msra.mxu0 %v1485_v14  ;;  %v1518_v14 = vld [vmem:[%s2426_s3 + $0x8c] sm:$0xf] }
  0x1f   :  { %178 = vmatpush.bf16.msra.mxu1 %v1493_v15  ;;  %v1394_v15 = vor.u32 %v1522_v13, %v1393_v12  ;;  %v1441_v12 = vld [vmem:[%s2426_s3 + $0xd8] sm:$0xf] }
  0x20   :  { %v1532_v13 = vld [vmem:[%s2426_s3 + $0xf4] sm:$0xf0] }
  0x21   :  { %166 = vmatmul.bf16.vlgmr.msra.gmra.mxu0 %v28_v20  ;;  %v1395_v20 = vld [vmem:[%s2426_s3 + $0xa8] sm:$0xf0]  ;;  %469 = vmatpush.bf16.msrb.mxu2 %v1394_v15  ;;  %v1442_v25 = vor.u32 %v1532_v13, %v1441_v12 }
  0x22   :  { %179 = vmatmul.bf16.vlgmr.msra.gmra.mxu1 %v29_v21  ;;  %496 = vmatpush.bf16.msrb.mxu0 %v1434_v30  ;;  %v1398_v21 = vor.u32 %v1518_v14, %v1395_v20  ;;  %v1528_v20 = vld [vmem:[%s2426_s3 + $0xdc] sm:$0xf] }
  0x23   :  { %510 = vmatpush.bf16.msrb.mxu1 %v1438_v33  ;;  %v1331_v33 = vld [vmem:[%s2426_s3 + $0x28] sm:$0xf0] }
  0x24   :  { %483 = vmatpush.bf16.msrb.mxu3 %v1398_v21  ;;  %v1334_v39 = vor.u32 %v1502_v32, %v1331_v33  ;;  %v1443_v21 = vld [vmem:[%s2426_s3 + $0xf8] sm:$0xf0]  ;;  %v1377_v33 = vld [vmem:[%s2426_s3 + $0x58] sm:$0xf] }
  0x25   :  { %470 = vmatpush.bf16.msrb.mxu2 %v1362_v26  ;;  %v1446_v26 = vor.u32 %v1528_v20, %v1443_v21 }
  0x26   :  { %497 = vmatpush.bf16.msrb.mxu0 %v1402_v42 }
  0x27   :  { %511 = vmatpush.bf16.msrb.mxu1 %v1406_v45  ;;  %v186_v45 = vld [vmem:[%s2427_s2 + $0x10] sm:$0xff] }
  0x28   :  { %484 = vmatpush.bf16.msrb.mxu3 %v1366_v27  ;;  %v1409_v27 = vld [vmem:[%s2426_s3 + $0x98] sm:$0xf] }
  0x29   :  { %471 = vmatpush.bf16.msrb.mxu2 %v1330_v35  ;;  %v1512_v35 = vld [vmem:[%s2426_s3 + $0x5c] sm:$0xf] }
  0x2a   :  { %498 = vmatpush.bf16.msrb.mxu0 %v1370_v54 }
  0x2b   :  { %512 = vmatpush.bf16.msrb.mxu1 %v1374_v57 }
  0x2c   :  { %485 = vmatpush.bf16.msrb.mxu3 %v1334_v39  ;;  %v1345_v39 = vld [vmem:[%s2426_s3 + $0x18] sm:$0xf] }
  0x2e   :  { %499 = vmatpush.bf16.msrb.mxu0 %v1338_v2 }
  0x2f   :  { %513 = vmatpush.bf16.msrb.mxu1 %v1342_v5 }
  0x32   :  { %1455 = vmatpush.msk.msra.mxu0 %vm559_vm0, %v1693_v17 }
  0x33   :  { %1458 = vmatpush.msk.msra.mxu1 %vm559_vm0, %v1703_v19 }
  0x34   :  { %581 = vmatpush.msra.mxu0 %v1688_v16 }
  0x35   :  { %604 = vmatpush.msra.mxu1 %v1698_v18 }
  0x9e   :  { %v167_v30 = vpop.f32.mrf.mxu0 }
  0x9f   :  { %v180_v31 = vpop.f32.mrf.mxu1 }
  0xa0   :  { %v181_v34 = vadd.f32 %v180_v31, %v167_v30  ;;  %v1411_v30 = vld [vmem:[%s2426_s3 + $0xb8] sm:$0xf0]  ;;  %v1410_v31 = vor.u32 %v1524_v28, %v1409_v27 }
  0xa1   :  { %v1414_v32 = vor.u32 %v1520_v29, %v1411_v30 }
  0xa2   :  { %v189_v36 = vrot.slane %v181_v34, 1  ;;  %v190_v37 = vrot.slane %v181_v34, 2  ;;  %v192_v38 = vperm.slane %v181_v34, 0  ;;  %212 = vst [vmem:[#allocation1] sm:$0xff] %v181_v34  ;;  %v191_v42 = vrot.slane %v181_v34, 3 }
  0xa3   :  { %v1516_v34 = vld [vmem:[%s2426_s3 + $0x74] sm:$0xf0] }
  0xa4   :  { %v193_v43 = vperm.slane %v189_v36, 0  ;;  %v194_v44 = vperm.slane %v190_v37, 0  ;;  %v200_v46 = vmul.f32 %v192_v38, %v184_v40  ;;  %v195_v51 = vperm.slane %v191_v42, 0  ;;  %v1379_v36 = vld [vmem:[%s2426_s3 + $0x78] sm:$0xf0] }
  0xa5   :  { %v1378_v37 = vor.u32 %v1516_v34, %v1377_v33  ;;  %v1382_v38 = vor.u32 %v1512_v35, %v1379_v36  ;;  %v1347_v42 = vld [vmem:[%s2426_s3 + $0x38] sm:$0xf0] }
  0xa6   :  { %v201_v47 = vmul.f32 %v193_v43, %v185_v41  ;;  %v169_v48 = vpop.f32.mrf.mxu0  ;;  %v202_v53 = vmul.f32 %v194_v44, %v186_v45  ;;  %v205_v57 = vsel %vm204_vm1, %v200_v46, 0.0  ;;  %v203_v3 = vmul.f32 %v195_v51, %v187_v50  ;;  %v551_v46 = vld [vmem:[%s2428_s4 + $0x8] sm:$0xff]  ;;  %v1478_v51 = vld [vmem:[%s2428_s4 + $0x38] sm:$0xff] }
  0xa7   :  { %v182_v49 = vpop.f32.mrf.mxu1  ;;  %v548_v48 = vld [vmem:[%s2429_s5] sm:$0xff] }
  0xa8   :  { %v206_v52 = vsel %vm204_vm1, %v201_v47, 0.0  ;;  %v208_v4 = vsel %vm204_vm1, %v202_v53, 0.0  ;;  %v210_v14 = vsel %vm204_vm1, %v203_v3, 0.0  ;;  %v1469_v47 = vld [vmem:[%s2428_s4 + $0x20] sm:$0xff]  ;;  %v1600_v49 = vmov 0  }
  0xa9   :  { %v214_v54 = vld [vmem:[#allocation1 + $0x4] ss:$9 sm:$0xff]  ;;  %v218_v56 = vld [vmem:[#allocation1 + $0x6] ss:$9 sm:$0xff]  ;;  %v207_v62 = vadd.f32 %v206_v52, %v205_v57  ;;  %1535 = vset.pattern.permute.xlu0 %v1600_v49 }
  0xaa   :  { %v216_v55 = vld [vmem:[#allocation1 + $0x5] ss:$9 sm:$0xff]  ;;  %v220_v58 = vld [vmem:[#allocation1 + $0x7] ss:$9 sm:$0xff]  ;;  %v221_v59 = vperm.slane %v214_v54, 0  ;;  %v223_v61 = vperm.slane %v218_v56, 0  ;;  %722 = vperm.xlu0 %1535, %v548_v48  }
  0xab   :  { %v222_v60 = vperm.slane %v216_v55, 0  ;;  %v224_v63 = vperm.slane %v220_v58, 0  ;;  %v209_v8 = vadd.f32 %v208_v4, %v207_v62 }
  0xac   :  { %v229_v0 = vmul.f32 %v221_v59, %v184_v40  ;;  %v231_v2 = vmul.f32 %v223_v61, %v186_v45  ;;  %v1508_v40 = vld [vmem:[%s2426_s3 + $0x34] sm:$0xf0]  ;;  %v550_v45 = vld [vmem:[%s2428_s4] sm:$0xff] }
  0xad   :  { %v230_v1 = vmul.f32 %v222_v60, %v185_v41  ;;  %v232_v5 = vmul.f32 %v224_v63, %v187_v50  ;;  %v211_v22 = vadd.f32 %v210_v14, %v209_v8  ;;  %v1504_v41 = vld [vmem:[%s2426_s3 + $0x1c] sm:$0xf]  ;;  %v1346_v43 = vor.u32 %v1508_v40, %v1345_v39  ;;  %v1470_v50 = vld [vmem:[%s2428_s4 + $0x28] sm:$0xff] }
  0xae   :  { %v233_v6 = vsel %vm204_vm1, %v229_v0, 0.0  ;;  %v236_v10 = vsel %vm204_vm1, %v231_v2, 0.0  ;;  %v1350_v44 = vor.u32 %v1504_v41, %v1347_v42 }
  0xaf   :  { %v234_v7 = vsel %vm204_vm1, %v230_v1, 0.0  ;;  %v238_v15 = vsel %vm204_vm1, %v232_v5, 0.0 }
  0xb0   :  { %v235_v9 = vadd.f32 %v234_v7, %v233_v6 }
  0xb2   :  { %v237_v11 = vadd.f32 %v236_v10, %v235_v9 }
  0xb4   :  { %v239_v23 = vadd.f32 %v238_v15, %v237_v11 }
  0xb6   :  { %v240_v24 = vpack.c.bf16 %v239_v23, %v211_v22 }
  0xb8   :  { %1447 = vmatmul.msk.bf16.vlgmr.msra.gmra.mxu2 %vm204_vm1, %v240_v24  ;;  %1448 = vmatmul.msk.bf16.vlgmr.msra.gmra.mxu3 %vm204_vm1, %v240_v24 }
  0xb9   :  { %1451 = vmatmul.msk.bf16.vlgmr.msrb.gmra.mxu0 %vm204_vm1, %v240_v24  ;;  %1452 = vmatmul.msk.bf16.vlgmr.msrb.gmra.mxu1 %vm204_vm1, %v240_v24 }
  0xba   :  { %524 = vmatpush.bf16.msra.mxu2 %v1442_v25  ;;  %538 = vmatpush.bf16.msra.mxu3 %v1446_v26 }
  0xbb   :  { %1471 = vmatpush.msk.msrb.mxu0 %vm559_vm0, %v1693_v17  ;;  %1474 = vmatpush.msk.msrb.mxu1 %vm559_vm0, %v1703_v19 }
  0xbd   :  { %933 = vmatpush.msrb.mxu0 %v1688_v16  ;;  %956 = vmatpush.msrb.mxu1 %v1698_v18 }
  0xbe   :  { %525 = vmatpush.bf16.msra.mxu2 %v1410_v31  ;;  %539 = vmatpush.bf16.msra.mxu3 %v1414_v32 }
  0xc2   :  { %526 = vmatpush.bf16.msra.mxu2 %v1378_v37  ;;  %540 = vmatpush.bf16.msra.mxu3 %v1382_v38 }
  0xc6   :  { %527 = vmatpush.bf16.msra.mxu2 %v1346_v43  ;;  %541 = vmatpush.bf16.msra.mxu3 %v1350_v44 }
  0xc8   :  { %1449 = vmatmul.msk.bf16.vlgmr.msrb.gmra.mxu2 %vm204_vm1, %v240_v24  ;;  %1450 = vmatmul.msk.bf16.vlgmr.msrb.gmra.mxu3 %vm204_vm1, %v240_v24 }
  0xc9   :  { %1456 = vmatmul.msk.f32.vlgmr.msra.gmra.mxu0 %vm552_vm2, %v550_v45  ;;  %1459 = vmatmul.msk.f32.vlgmr.msra.gmra.mxu1 %vm552_vm2, %v550_v45 }
  0xca   :  { %1463 = vmatpush.msk.msrb.mxu2 %vm559_vm0, %v1693_v17  ;;  %1466 = vmatpush.msk.msrb.mxu3 %vm559_vm0, %v1703_v19 }
  0xcc   :  { %762 = vmatpush.msrb.mxu2 %v1688_v16  ;;  %785 = vmatpush.msrb.mxu3 %v1698_v18 }
  0xd1   :  { %1457 = vmatmul.msk.f32.gmra.mxu0 %vm552_vm2, %v551_v46  ;;  %1460 = vmatmul.msk.f32.gmra.mxu1 %vm552_vm2, %v551_v46  ;;  %v1601_v46 = vmov -1.0  }
  0xd8   :  { %1453 = vmatmul.msk.bf16.vlgmr.msra.gmra.mxu2 %vm204_vm1, %v240_v24  ;;  %1454 = vmatmul.msk.bf16.vlgmr.msra.gmra.mxu3 %vm204_vm1, %v240_v24 }
  0xd9   :  { %1472 = vmatmul.msk.f32.vlgmr.msrb.gmra.mxu0 %vm552_vm2, %v1469_v47  ;;  %1475 = vmatmul.msk.f32.vlgmr.msrb.gmra.mxu1 %vm552_vm2, %v1469_v47 }
  0xda   :  { %1479 = vmatpush.msk.msra.mxu2 %vm559_vm0, %v1693_v17  ;;  %1482 = vmatpush.msk.msra.mxu3 %vm559_vm0, %v1703_v19  ;;  %v549_v17 = vld [vmem:[%s2429_s5 + $0x8] sm:$0xff]  ;;  %v1461_v19 = vld [vmem:[%s2428_s4 + $0x10] sm:$0xff] }
  0xdb   :  { %727 = vperm.xlu0 %1535, %v549_v17  }
  0xdc   :  { %1104 = vmatpush.msra.mxu2 %v1688_v16  ;;  %1127 = vmatpush.msra.mxu3 %v1698_v18  ;;  %v1462_v16 = vld [vmem:[%s2428_s4 + $0x18] sm:$0xff]  ;;  %v1477_v18 = vld [vmem:[%s2428_s4 + $0x30] sm:$0xff] }
  0xe1   :  { %1473 = vmatmul.msk.f32.gmra.mxu0 %vm552_vm2, %v1470_v50  ;;  %1476 = vmatmul.msk.f32.gmra.mxu1 %vm552_vm2, %v1470_v50 }
  0xe8   :  { %1464 = vmatmul.msk.f32.vlgmr.msrb.gmra.mxu2 %vm552_vm2, %v1461_v19  ;;  %1467 = vmatmul.msk.f32.vlgmr.msrb.gmra.mxu3 %vm552_vm2, %v1461_v19 }
  0xf0   :  { %1465 = vmatmul.msk.f32.gmra.mxu2 %vm552_vm2, %v1462_v16  ;;  %1468 = vmatmul.msk.f32.gmra.mxu3 %vm552_vm2, %v1462_v16 }
  0xf8   :  { %1480 = vmatmul.msk.f32.vlgmr.msra.gmra.mxu2 %vm552_vm2, %v1477_v18  ;;  %1483 = vmatmul.msk.f32.vlgmr.msra.gmra.mxu3 %vm552_vm2, %v1477_v18 }
 0x100   :  { %1481 = vmatmul.msk.f32.gmra.mxu2 %vm552_vm2, %v1478_v51  ;;  %1484 = vmatmul.msk.f32.gmra.mxu3 %vm552_vm2, %v1478_v51 }
 0x136   :  { %v501_v52 = vpop.f32.mrf.mxu0  ;;  %v515_v53 = vpop.f32.mrf.mxu1 }
 0x13b   :  { %v445_v54 = vpop.f32.mrf.mxu2  ;;  %v459_v55 = vpop.f32.mrf.mxu3 }
 0x13e   :  { %v1999_v56 = vpop.f32.mrf.mxu0  ;;  %v2001_v57 = vpop.f32.mrf.mxu1 }
 0x143   :  { %v447_v58 = vpop.f32.mrf.mxu2  ;;  %v461_v59 = vpop.f32.mrf.mxu3 }
 0x146   :  { %v583_v60 = vpop.f32.mrf.mxu0  ;;  %v606_v61 = vpop.f32.mrf.mxu1 }
 0x147   :  { %v612_v62 = vadd.f32 %v583_v60, %v445_v54  ;;  %v613_v63 = vadd.f32 %v606_v61, %v459_v55 }
 0x149   :  { %v616_v0 = vmul.f32 0.70710677, %v612_v62  ;;  %v617_v1 = vmul.f32 0.70710677, %v613_v63  ;;  %v2036_v43 = vmul.f32 0.5, %v612_v62  ;;  %v2043_v49 = vmul.f32 0.5, %v613_v63 }
 0x14b   :  { %v628_v2 = vand.u32 2147483647, %v616_v0  ;;  %v629_v3 = vand.u32 2147483647, %v617_v1  ;;  %v2003_v4 = vpop.f32.mrf.mxu2  ;;  %v2005_v11 = vpop.f32.mrf.mxu3  ;;  %vm620_vm3 = vcmp.ge.f32.partialorder %v616_v0, 0.0  ;;  %vm621_vm4 = vcmp.ge.f32.partialorder %v617_v1, 0.0 }
 0x14c   :  { %v2040_v47 = vsel %vm620_vm3, 1.0, %v1601_v46  ;;  %v2049_v17 = vsel %vm621_vm4, 1.0, %v1601_v46 }
 0x14d   :  { %v632_v5 = vmul.f32 0.3275911, %v628_v2  ;;  %v633_v6 = vmul.f32 0.3275911, %v629_v3  ;;  %v680_v14 = vsub.f32 0.0, %v628_v2  ;;  %v681_v21 = vsub.f32 0.0, %v629_v3 }
 0x14e   :  { %v586_v7 = vpop.f32.mrf.mxu0  ;;  %v609_v8 = vpop.f32.mrf.mxu1 }
 0x14f   :  { %v636_v9 = vadd.f32 1.0, %v632_v5  ;;  %v637_v10 = vadd.f32 1.0, %v633_v6  ;;  %v614_v12 = vadd.f32 %v586_v7, %v447_v58  ;;  %v615_v13 = vadd.f32 %v609_v8, %v461_v59 }
 0x150   :  { %v684_v25 = vmul.f32 %v680_v14, %v628_v2  ;;  %v685_v30 = vmul.f32 %v681_v21, %v629_v3 }
 0x151   :  { %1536 = vrcp.f32 %v636_v9  ;;  %v2007_v15 = vmul.f32 0.70710677, %v614_v12  ;;  %v2009_v20 = vmul.f32 0.70710677, %v615_v13  ;;  %v2052_v16 = vmul.f32 0.5, %v614_v12 }
 0x152   :  { %1538 = vrcp.f32 %v637_v10  ;;  %v688_v42 = vmul.f32 1.442695, %v684_v25  ;;  %v690_v45 = vmul.f32 1.442695, %v685_v30 }
 0x153   :  { %v2012_v22 = vand.u32 2147483647, %v2007_v15  ;;  %v2015_v23 = vand.u32 2147483647, %v2009_v20  ;;  %v2017_v24 = vpop.f32.mrf.mxu2  ;;  %v2029_v38 = vpop.f32.mrf.mxu3  ;;  %vm622_vm5 = vcmp.ge.f32.partialorder %v2007_v15, 0.0  ;;  %vm623_vm6 = vcmp.ge.f32.partialorder %v2009_v20, 0.0 }
 0x154   :  { %v2088_v25 = vsel %vm622_vm5, 1.0, %v1601_v46 }
 0x155   :  { %v634_v26 = vmul.f32 0.3275911, %v2012_v22  ;;  %v635_v31 = vmul.f32 0.3275911, %v2015_v23  ;;  %v682_v58 = vsub.f32 0.0, %v2012_v22  ;;  %v683_v8 = vsub.f32 0.0, %v2015_v23 }
 0x156   :  { %v935_v27 = vpop.f32.mrf.mxu0  ;;  %v958_v28 = vpop.f32.mrf.mxu1 }
 0x157   :  { %v2020_v29 = vpop.eup %1536  ;;  %v2023_v32 = vadd.f32 %v935_v27, %v501_v52  ;;  %v638_v35 = vadd.f32 1.0, %v634_v26  ;;  %v639_v37 = vadd.f32 1.0, %v635_v31  ;;  %v2034_v40 = vadd.f32 %v958_v28, %v515_v53 }
 0x158   :  { %v2025_v33 = vpop.eup %1538  ;;  %v644_v34 = vmul.f32 1.0614054, %v2020_v29  ;;  %v2057_v52 = vmul.f32 0.5, %v615_v13  ;;  %v2098_v31 = vsel %vm623_vm6, 1.0, %v1601_v46 }
 0x159   :  { %v645_v36 = vmul.f32 1.0614054, %v2025_v33  ;;  %v2032_v39 = vmul.f32 0.70710677, %v2023_v32  ;;  %1540 = vrcp.f32 %v638_v35  ;;  %v2055_v18 = vmul.f32 0.70710677, %v2034_v40 }
 0x15a   :  { %v648_v41 = vadd.f32 -1.4531521, %v644_v34  ;;  %1542 = vrcp.f32 %v639_v37  ;;  %v687_v35 = vmul.f32 %v683_v8, %v2015_v23 }
 0x15b   :  { %v649_v44 = vadd.f32 -1.4531521, %v645_v36  ;;  %v2046_v50 = vand.u32 2147483647, %v2032_v39  ;;  %1544 = vpow2.f32 %v688_v42  ;;  %v2062_v59 = vand.u32 2147483647, %v2055_v18  ;;  %v2068_v63 = vpop.f32.mrf.mxu2  ;;  %v2082_v13 = vpop.f32.mrf.mxu3 }
 0x15c   :  { %v652_v48 = vmul.f32 %v2020_v29, %v648_v41  ;;  %1546 = vpow2.f32 %v690_v45  ;;  %vm972_vm7 = vcmp.ge.f32.partialorder %v2032_v39, 0.0  ;;  %v2164_v39 = vpop.permute.xlu0 %722  ;;  %vm973_vm8 = vcmp.ge.f32.partialorder %v2055_v18, 0.0 }
 0x15d   :  { %v653_v19 = vmul.f32 %v2025_v33, %v649_v44  ;;  %v984_v53 = vmul.f32 0.3275911, %v2046_v50  ;;  %v985_v5 = vmul.f32 0.3275911, %v2062_v59  ;;  %v1032_v20 = vsub.f32 0.0, %v2046_v50 }
 0x15e   :  { %v656_v51 = vadd.f32 1.4214138, %v652_v48  ;;  %v938_v54 = vpop.f32.mrf.mxu0 }
 0x15f   :  { %v657_v55 = vadd.f32 1.4214138, %v653_v19  ;;  %v2064_v60 = vpop.eup %1540  ;;  %v988_v62 = vadd.f32 1.0, %v984_v53  ;;  %v2071_v0 = vadd.f32 %v938_v54, %v1999_v56  ;;  %v686_v56 = vmul.f32 %v682_v58, %v2012_v22 }
 0x160   :  { %v660_v61 = vmul.f32 %v2020_v29, %v656_v51  ;;  %v2073_v1 = vpop.eup %1542  ;;  %v646_v3 = vmul.f32 1.0614054, %v2064_v60  ;;  %v989_v12 = vadd.f32 1.0, %v985_v5  ;;  %v961_v51 = vpop.f32.mrf.mxu1 }
 0x161   :  { %v661_v2 = vmul.f32 %v2025_v33, %v657_v55  ;;  %v647_v7 = vmul.f32 1.0614054, %v2073_v1  ;;  %1548 = vrcp.f32 %v988_v62  ;;  %v1545_v14 = vpop.eup %1544  ;;  %v2091_v27 = vmul.f32 0.70710677, %v2071_v0 }
 0x162   :  { %v664_v6 = vadd.f32 -0.28449672, %v660_v61  ;;  %v650_v10 = vadd.f32 -1.4531521, %v646_v3  ;;  %v1547_v28 = vpop.eup %1546  ;;  %1550 = vrcp.f32 %v989_v12  ;;  %v692_v42 = vmul.f32 1.442695, %v686_v56 }
 0x163   :  { %v665_v9 = vadd.f32 -0.28449672, %v661_v2  ;;  %v651_v26 = vadd.f32 -1.4531521, %v647_v7  ;;  %v982_v36 = vand.u32 2147483647, %v2091_v27  ;;  %v2112_v3 = vpop.f32.mrf.mxu2 }
 0x164   :  { %v668_v21 = vmul.f32 %v2020_v29, %v664_v6  ;;  %v654_v22 = vmul.f32 %v2064_v60, %v650_v10  ;;  %v1033_v55 = vsub.f32 0.0, %v2062_v59  ;;  %v694_v62 = vmul.f32 1.442695, %v687_v35 }
 0x165   :  { %v669_v30 = vmul.f32 %v2025_v33, %v665_v9  ;;  %v655_v15 = vmul.f32 %v2073_v1, %v651_v26  ;;  %v986_v19 = vmul.f32 0.3275911, %v982_v36  ;;  %v1036_v9 = vmul.f32 %v1032_v20, %v2046_v50  ;;  %v2124_v26 = vpop.f32.mrf.mxu3 }
 0x166   :  { %v672_v34 = vadd.f32 0.2548296, %v668_v21  ;;  %v658_v41 = vadd.f32 1.4214138, %v654_v22  ;;  %v1037_v21 = vmul.f32 %v1033_v55, %v2062_v59  ;;  %vm974_vm9 = vcmp.ge.f32.partialorder %v2091_v27, 0.0 }
 0x167   :  { %v673_v37 = vadd.f32 0.2548296, %v669_v30  ;;  %v2103_v44 = vpop.eup %1548  ;;  %v659_v48 = vadd.f32 1.4214138, %v655_v15  ;;  %v990_v2 = vadd.f32 1.0, %v986_v19  ;;  %v1034_v15 = vsub.f32 0.0, %v982_v36 }
 0x168   :  { %v676_v45 = vmul.f32 %v2020_v29, %v672_v34  ;;  %v662_v54 = vmul.f32 %v2064_v60, %v658_v41  ;;  %v996_v23 = vmul.f32 1.0614054, %v2103_v44  ;;  %v2114_v29 = vpop.eup %1550  ;;  %v2131_v41 = vmul.f32 0.5, %v2023_v32 }
 0x169   :  { %v677_v53 = vmul.f32 %v2025_v33, %v673_v37  ;;  %v663_v61 = vmul.f32 %v2073_v1, %v659_v48  ;;  %v2117_v33 = vadd.f32 %v961_v51, %v2001_v57  ;;  %v997_v10 = vmul.f32 1.0614054, %v2114_v29 }
 0x16a   :  { %v696_v58 = vmul.f32 %v1545_v14, %v676_v45  ;;  %v666_v6 = vadd.f32 -0.28449672, %v662_v54  ;;  %v1000_v7 = vadd.f32 -1.4531521, %v996_v23  ;;  %1552 = vrcp.f32 %v990_v2 }
 0x16b   :  { %v697_v5 = vmul.f32 %v1547_v28, %v677_v53  ;;  %v667_v8 = vadd.f32 -0.28449672, %v663_v61  ;;  %v1001_v57 = vadd.f32 -1.4531521, %v997_v10  ;;  %v2128_v22 = vmul.f32 0.70710677, %v2117_v33 }
 0x16c   :  { %v700_v56 = vsub.f32 1.0, %v696_v58  ;;  %v670_v12 = vmul.f32 %v2064_v60, %v666_v6  ;;  %v1004_v14 = vmul.f32 %v2103_v44, %v1000_v7  ;;  %1554 = vpow2.f32 %v692_v42 }
 0x16d   :  { %v701_v28 = vsub.f32 1.0, %v697_v5  ;;  %v671_v30 = vmul.f32 %v2073_v1, %v667_v8  ;;  %v1040_v37 = vmul.f32 1.442695, %v1036_v9  ;;  %v1005_v59 = vmul.f32 %v2114_v29, %v1001_v57 }
 0x16e   :  { %v674_v50 = vadd.f32 0.2548296, %v670_v12  ;;  %v1008_v34 = vadd.f32 1.4214138, %v1004_v14  ;;  %v704_v45 = vmul.f32 %v700_v56, %v2040_v47  ;;  %1556 = vpow2.f32 %v694_v62  ;;  %v787_v14 = vpop.f32.mrf.mxu3 }
 0x16f   :  { %v675_v35 = vadd.f32 0.2548296, %v671_v30  ;;  %v1042_v20 = vmul.f32 1.442695, %v1037_v21  ;;  %v705_v51 = vmul.f32 %v701_v28, %v2049_v17  ;;  %v1009_v53 = vadd.f32 1.4214138, %v1005_v59  ;;  %v764_v17 = vpop.f32.mrf.mxu2 }
 0x170   :  { %v1012_v48 = vmul.f32 %v2103_v44, %v1008_v34  ;;  %v2136_v19 = vpop.eup %1552  ;;  %v678_v42 = vmul.f32 %v2064_v60, %v674_v50  ;;  %v2141_v54 = vand.u32 2147483647, %v2128_v22  ;;  %v1038_v47 = vmul.f32 %v1034_v15, %v982_v36 }
 0x171   :  { %v998_v23 = vmul.f32 1.0614054, %v2136_v19  ;;  %v679_v55 = vmul.f32 %v2073_v1, %v675_v35  ;;  %1558 = vpow2.f32 %v1040_v37  ;;  %v1013_v58 = vmul.f32 %v2114_v29, %v1009_v53 }
 0x172   :  { %v1016_v32 = vadd.f32 -0.28449672, %v1012_v48  ;;  %v987_v61 = vmul.f32 0.3275911, %v2141_v54  ;;  %v1555_v62 = vpop.eup %1554  ;;  %v712_v60 = vadd.f32 1.0, %v704_v45  ;;  %1560 = vpow2.f32 %v1042_v20 }
 0x173   :  { %v1002_v5 = vadd.f32 -1.4531521, %v998_v23  ;;  %v713_v6 = vadd.f32 1.0, %v705_v51  ;;  %v698_v7 = vmul.f32 %v1555_v62, %v678_v42  ;;  %v1017_v8 = vadd.f32 -0.28449672, %v1013_v58 }
 0x174   :  { %v1020_v2 = vmul.f32 %v2103_v44, %v1016_v32  ;;  %v991_v9 = vadd.f32 1.0, %v987_v61  ;;  %v1557_v10 = vpop.eup %1556  ;;  %v1044_v56 = vmul.f32 1.442695, %v1038_v47  ;;  %v2151_v12 = vadd.f32 %v764_v17, %v2003_v4 }
 0x175   :  { %v1006_v1 = vmul.f32 %v2136_v19, %v1002_v5  ;;  %v699_v21 = vmul.f32 %v1557_v10, %v679_v55  ;;  %v976_v28 = vsel %vm972_vm7, 1.0, %v1601_v46  ;;  %v1021_v30 = vmul.f32 %v2114_v29, %v1017_v8 }
 0x176   :  { %v1024_v36 = vadd.f32 0.2548296, %v1020_v2  ;;  %1562 = vrcp.f32 %v991_v9  ;;  %v716_v57 = vmul.f32 %v712_v60, %v2036_v43  ;;  %v2160_v15 = vmul.f32 0.70710677, %v2151_v12 }
 0x177   :  { %v1010_v34 = vadd.f32 1.4214138, %v1006_v1  ;;  %v1559_v35 = vpop.eup %1558  ;;  %v717_v4 = vmul.f32 %v713_v6, %v2043_v49  ;;  %v702_v37 = vsub.f32 1.0, %v698_v7  ;;  %v1025_v59 = vadd.f32 0.2548296, %v1021_v30  ;;  %v790_v1 = vpop.f32.mrf.mxu3 }
 0x178   :  { %v1028_v50 = vmul.f32 %v2103_v44, %v1024_v36  ;;  %v1061_v45 = vmul.f32 0.5, %v2034_v40  ;;  %v1561_v48 = vpop.eup %1560  ;;  %1564 = vpow2.f32 %v1044_v56  ;;  %v703_v44 = vsub.f32 1.0, %v699_v21  ;;  %v767_v36 = vpop.f32.mrf.mxu2 }
 0x179   :  { %v1014_v43 = vmul.f32 %v2136_v19, %v1010_v34  ;;  %v1029_v51 = vmul.f32 %v2114_v29, %v1025_v59  ;;  %v1035_v42 = vsub.f32 0.0, %v2141_v54  ;;  %v2171_v49 = vand.u32 2147483647, %v2160_v15 }
 0x17a   :  { %v1048_v20 = vmul.f32 %v1559_v35, %v1028_v50  ;;  %v2174_v40 = vadd.f32 %v787_v14, %v2005_v11  ;;  %v730_v23 = vadd.f32 %v2164_v39, %v716_v57  ;;  %v706_v55 = vmul.f32 %v702_v37, %v2088_v25 }
 0x17b   :  { %v1018_v32 = vadd.f32 -0.28449672, %v1014_v43  ;;  %v1049_v58 = vmul.f32 %v1561_v48, %v1029_v51  ;;  %v813_v61 = vmul.f32 0.3275911, %v2171_v49  ;;  %v731_v29 = vadd.f32 %v2164_v39, %v717_v4  ;;  %v2218_v51 = vpop.permute.xlu0 %727 }
 0x17c   :  { %v1052_v53 = vsub.f32 1.0, %v1048_v20  ;;  %v2177_v47 = vpop.eup %1562  ;;  %v2185_v2 = vmul.f32 0.70710677, %v2174_v40  ;;  %734 = vst [vmem:[%s2430_s6] sm:$0xff] %v730_v23  ;;  %v977_v11 = vsel %vm973_vm8, 1.0, %v1601_v46  ;;  %v1039_v10 = vmul.f32 %v1035_v42, %v2141_v54 }
 0x17d   :  { %v1022_v62 = vmul.f32 %v2136_v19, %v1018_v32  ;;  %v999_v60 = vmul.f32 1.0614054, %v2177_v47  ;;  %v1053_v25 = vsub.f32 1.0, %v1049_v58  ;;  %v817_v5 = vadd.f32 1.0, %v813_v61  ;;  %735 = vst [vmem:[%s2430_s6 + $0x8] sm:$0xff] %v731_v29 }
 0x17e   :  { %v1056_v17 = vmul.f32 %v1052_v53, %v976_v28  ;;  %v1565_v6 = vpop.eup %1564  ;;  %v714_v56 = vadd.f32 1.0, %v706_v55  ;;  %v707_v18 = vmul.f32 %v703_v44, %v2098_v31  ;;  %v810_v57 = vand.u32 2147483647, %v2185_v2 }
 0x17f   :  { %v1026_v8 = vadd.f32 0.2548296, %v1022_v62  ;;  %v1003_v9 = vadd.f32 -1.4531521, %v999_v60  ;;  %v1057_v14 = vmul.f32 %v1053_v25, %v977_v11  ;;  %1566 = vrcp.f32 %v817_v5 }
 0x180   :  { %v1064_v7 = vadd.f32 1.0, %v1056_v17  ;;  %v978_v54 = vsel %vm974_vm9, 1.0, %v1601_v46  ;;  %v2207_v34 = vadd.f32 %v767_v36, %v2017_v24  ;;  %v2210_v31 = vadd.f32 %v790_v1, %v2029_v38  ;;  %v1106_v11 = vpop.f32.mrf.mxu2 }
 0x181   :  { %v1030_v28 = vmul.f32 %v2136_v19, %v1026_v8  ;;  %v1007_v30 = vmul.f32 %v2177_v47, %v1003_v9  ;;  %v1065_v50 = vadd.f32 1.0, %v1057_v14  ;;  %v814_v37 = vmul.f32 0.3275911, %v810_v57 }
 0x182   :  { %v1068_v21 = vmul.f32 %v1064_v7, %v2131_v41  ;;  %v1046_v41 = vmul.f32 1.442695, %v1039_v10  ;;  %v718_v19 = vmul.f32 %v714_v56, %v2052_v16  ;;  %v2215_v20 = vmul.f32 0.70710677, %v2207_v34 }
 0x183   :  { %v1050_v35 = vmul.f32 %v1565_v6, %v1030_v28  ;;  %v1011_v4 = vadd.f32 1.4214138, %v1007_v30  ;;  %v1069_v59 = vmul.f32 %v1065_v50, %v1061_v45  ;;  %v715_v27 = vadd.f32 1.0, %v707_v18 }
 0x184   :  { %v1072_v48 = vadd.f32 %v1068_v21, %v2164_v39  ;;  %v818_v44 = vadd.f32 1.0, %v814_v37  ;;  %v861_v42 = vsub.f32 0.0, %v2171_v49  ;;  %v2228_v16 = vand.u32 2147483647, %v2215_v20 }
 0x185   :  { %v1054_v43 = vsub.f32 1.0, %v1050_v35  ;;  %v1015_v24 = vmul.f32 %v2177_v47, %v1011_v4  ;;  %v2220_v38 = vpop.eup %1566  ;;  %v1073_v53 = vadd.f32 %v1069_v59, %v2164_v39  ;;  %v2231_v45 = vmul.f32 0.70710677, %v2210_v31 }
 0x186   :  { %1076 = vst [vmem:[%s2430_s6 + $0x20] sm:$0xff] %v1072_v48  ;;  %v825_v55 = vmul.f32 1.0614054, %v2220_v38  ;;  %1568 = vrcp.f32 %v818_v44  ;;  %v1062_v58 = vmul.f32 0.5, %v2071_v0  ;;  %v815_v61 = vmul.f32 0.3275911, %v2228_v16 }
 0x187   :  { %v1058_v32 = vmul.f32 %v1054_v43, %v978_v54  ;;  %v1019_v23 = vadd.f32 -0.28449672, %v1015_v24  ;;  %1570 = vpow2.f32 %v1046_v41  ;;  %1077 = vst [vmem:[%s2430_s6 + $0x28] sm:$0xff] %v1073_v53  ;;  %v732_v29 = vadd.f32 %v2218_v51, %v718_v19  ;;  %v1129_v41 = vpop.f32.mrf.mxu3 }
 0x188   :  { %vm975_vm10 = vcmp.ge.f32.partialorder %v2128_v22, 0.0  ;;  %v829_v60 = vadd.f32 -1.4531521, %v825_v55  ;;  %v719_v25 = vmul.f32 %v715_v27, %v2057_v52  ;;  %v865_v0 = vmul.f32 %v861_v42, %v2171_v49  ;;  %v1109_v42 = vpop.f32.mrf.mxu2 }
 0x189   :  { %v1066_v17 = vadd.f32 1.0, %v1058_v32  ;;  %v1023_v62 = vmul.f32 %v2177_v47, %v1019_v23  ;;  %v819_v5 = vadd.f32 1.0, %v815_v61  ;;  %v2245_v6 = vand.u32 2147483647, %v2231_v45  ;;  %736 = vst [vmem:[%s2430_s6 + $0x40] sm:$0xff] %v732_v29 }
 0x18a   :  { %v833_v9 = vmul.f32 %v2220_v38, %v829_v60  ;;  %v862_v10 = vsub.f32 0.0, %v810_v57  ;;  %v979_v52 = vsel %vm975_vm10, 1.0, %v1601_v46  ;;  %v869_v14 = vmul.f32 1.442695, %v865_v0 }
 0x18b   :  { %v1070_v7 = vmul.f32 %v1066_v17, %v1062_v58  ;;  %v1027_v8 = vadd.f32 0.2548296, %v1023_v62  ;;  %1572 = vrcp.f32 %v819_v5  ;;  %v816_v36 = vmul.f32 0.3275911, %v2245_v6 }
 0x18c   :  { %v2252_v1 = vpop.eup %1568  ;;  %v837_v56 = vadd.f32 1.4214138, %v833_v9  ;;  %v733_v30 = vadd.f32 %v2218_v51, %v719_v25  ;;  %v866_v35 = vmul.f32 %v862_v10, %v810_v57  ;;  %v863_v22 = vsub.f32 0.0, %v2228_v16 }
 0x18d   :  { %v1031_v49 = vmul.f32 %v2177_v47, %v1027_v8  ;;  %v1571_v18 = vpop.eup %1570  ;;  %v826_v21 = vmul.f32 1.0614054, %v2252_v1  ;;  %v820_v28 = vadd.f32 1.0, %v816_v36  ;;  %v1074_v4 = vadd.f32 %v1070_v7, %v2218_v51 }
 0x18e   :  { %v841_v54 = vmul.f32 %v2220_v38, %v837_v56  ;;  %737 = vst [vmem:[%s2430_s6 + $0x48] sm:$0xff] %v733_v30  ;;  %v2267_v47 = vadd.f32 %v1106_v11, %v2068_v63  ;;  %v1063_v59 = vmul.f32 0.5, %v2117_v33  ;;  %v2271_v57 = vmul.f32 0.5, %v2151_v12 }
 0x18f   :  { %v1051_v50 = vmul.f32 %v1571_v18, %v1031_v49  ;;  %v830_v37 = vadd.f32 -1.4531521, %v826_v21  ;;  %1574 = vrcp.f32 %v820_v28  ;;  %1078 = vst [vmem:[%s2430_s6 + $0x60] sm:$0xff] %v1074_v4  ;;  %v2283_v63 = vadd.f32 %v1129_v41, %v2082_v13 }
 0x190   :  { %v845_v48 = vadd.f32 -0.28449672, %v841_v54  ;;  %1576 = vpow2.f32 %v869_v14  ;;  %v2280_v24 = vmul.f32 0.70710677, %v2267_v47  ;;  %vm801_vm11 = vcmp.ge.f32.partialorder %v2160_v15, 0.0 }
 0x191   :  { %v1055_v19 = vsub.f32 1.0, %v1051_v50  ;;  %v2276_v27 = vpop.eup %1572  ;;  %v834_v43 = vmul.f32 %v2252_v1, %v830_v37  ;;  %v871_v32 = vmul.f32 1.442695, %v866_v35  ;;  %v867_v23 = vmul.f32 %v863_v22, %v2228_v16 }
 0x192   :  { %v849_v12 = vmul.f32 %v2220_v38, %v845_v48  ;;  %v827_v44 = vmul.f32 1.0614054, %v2276_v27  ;;  %v2290_v55 = vand.u32 2147483647, %v2280_v24  ;;  %v864_v13 = vsub.f32 0.0, %v2245_v6 }
 0x193   :  { %v1059_v33 = vmul.f32 %v1055_v19, %v979_v52  ;;  %v838_v53 = vadd.f32 1.4214138, %v834_v43  ;;  %v2298_v11 = vmul.f32 0.70710677, %v2283_v63  ;;  %v2301_v25 = vadd.f32 %v1109_v42, %v2112_v3 }
 0x194   :  { %v853_v61 = vadd.f32 0.2548296, %v849_v12  ;;  %v831_v29 = vadd.f32 -1.4531521, %v827_v44  ;;  %v1155_v60 = vmul.f32 0.3275911, %v2290_v55  ;;  %1578 = vpow2.f32 %v871_v32 }
 0x195   :  { %v1067_v58 = vadd.f32 1.0, %v1059_v33  ;;  %v2293_v17 = vpop.eup %1574  ;;  %v842_v62 = vmul.f32 %v2252_v1, %v838_v53  ;;  %v873_v10 = vmul.f32 1.442695, %v867_v23  ;;  %v868_v14 = vmul.f32 %v864_v13, %v2245_v6 }
 0x196   :  { %v857_v0 = vmul.f32 %v2220_v38, %v853_v61  ;;  %v835_v5 = vmul.f32 %v2276_v27, %v831_v29  ;;  %v828_v7 = vmul.f32 1.0614054, %v2293_v17  ;;  %v1577_v8 = vpop.eup %1576  ;;  %v1159_v36 = vadd.f32 1.0, %v1155_v60  ;;  %v1132_v61 = vpop.f32.mrf.mxu3 }
 0x197   :  { %v1071_v16 = vmul.f32 %v1067_v58, %v1063_v59  ;;  %v846_v9 = vadd.f32 -0.28449672, %v842_v62  ;;  %v2310_v38 = vand.u32 2147483647, %v2298_v11  ;;  %v2318_v50 = vmul.f32 0.70710677, %v2301_v25 }
 0x198   :  { %v877_v52 = vmul.f32 %v1577_v8, %v857_v0  ;;  %v839_v49 = vadd.f32 1.4214138, %v835_v5  ;;  %v832_v56 = vadd.f32 -1.4531521, %v828_v7  ;;  %1580 = vrcp.f32 %v1159_v36 }
 0x199   :  { %v1075_v18 = vadd.f32 %v1071_v16, %v2218_v51  ;;  %v850_v3 = vmul.f32 %v2252_v1, %v846_v9  ;;  %v805_v6 = vsel %vm801_vm11, 1.0, %v1601_v46  ;;  %v890_v35 = vmul.f32 0.5, %v2174_v40 }
 0x19a   :  { %v881_v21 = vsub.f32 1.0, %v877_v52  ;;  %v843_v28 = vmul.f32 %v2276_v27, %v839_v49  ;;  %v836_v30 = vmul.f32 %v2293_v17, %v832_v56  ;;  %v1156_v4 = vmul.f32 0.3275911, %v2310_v38  ;;  %v1579_v19 = vpop.eup %1578 }
 0x19b   :  { %1079 = vst [vmem:[%s2430_s6 + $0x68] sm:$0xff] %v1075_v18  ;;  %v854_v54 = vadd.f32 0.2548296, %v850_v3  ;;  %vm802_vm12 = vcmp.ge.f32.partialorder %v2185_v2, 0.0  ;;  %1582 = vpow2.f32 %v873_v10  ;;  %v875_v48 = vmul.f32 1.442695, %v868_v14 }
 0x19c   :  { %v885_v41 = vmul.f32 %v881_v21, %v805_v6  ;;  %v847_v37 = vadd.f32 -0.28449672, %v843_v28  ;;  %v840_v22 = vadd.f32 1.4214138, %v836_v30  ;;  %v1160_v43 = vadd.f32 1.0, %v1156_v4 }
 0x19d   :  { %v858_v59 = vmul.f32 %v2252_v1, %v854_v54  ;;  %v2330_v40 = vand.u32 2147483647, %v2318_v50  ;;  %v806_v2 = vsel %vm802_vm12, 1.0, %v1601_v46  ;;  %v1203_v53 = vsub.f32 0.0, %v2290_v55 }
 0x19e   :  { %v893_v33 = vadd.f32 1.0, %v885_v41  ;;  %v851_v15 = vmul.f32 %v2276_v27, %v847_v37  ;;  %v844_v12 = vmul.f32 %v2293_v17, %v840_v22  ;;  %v2332_v44 = vpop.eup %1580  ;;  %1584 = vrcp.f32 %v1160_v43 }
 0x19f   :  { %v878_v42 = vmul.f32 %v1579_v19, %v858_v59  ;;  %v1167_v58 = vmul.f32 1.0614054, %v2332_v44  ;;  %vm803_vm13 = vcmp.ge.f32.partialorder %v2215_v20, 0.0  ;;  %1586 = vpow2.f32 %v875_v48 }
 0x1a0   :  { %v897_v1 = vmul.f32 %v893_v33, %v2271_v57  ;;  %v855_v32 = vadd.f32 0.2548296, %v851_v15  ;;  %v848_v23 = vadd.f32 -0.28449672, %v844_v12  ;;  %v1157_v13 = vmul.f32 0.3275911, %v2330_v40 }
 0x1a1   :  { %v882_v29 = vsub.f32 1.0, %v878_v42  ;;  %v1171_v0 = vadd.f32 -1.4531521, %v1167_v58  ;;  %v1583_v5 = vpop.eup %1582  ;;  %v1207_v7 = vmul.f32 %v1203_v53, %v2290_v55  ;;  %v2345_v9 = vadd.f32 %v1132_v61, %v2124_v26 }
 0x1a2   :  { %v901_v62 = vadd.f32 %v897_v1, %v2164_v39  ;;  %v859_v60 = vmul.f32 %v2276_v27, %v855_v32  ;;  %v852_v16 = vmul.f32 %v2293_v17, %v848_v23  ;;  %v1161_v8 = vadd.f32 1.0, %v1157_v13 }
 0x1a3   :  { %v886_v57 = vmul.f32 %v882_v29, %v806_v2  ;;  %v807_v20 = vsel %vm803_vm13, 1.0, %v1601_v46  ;;  %v1175_v27 = vmul.f32 %v2332_v44, %v1171_v0  ;;  %v1204_v56 = vsub.f32 0.0, %v2310_v38 }
 0x1a4   :  { %905 = vst [vmem:[%s2430_s6 + $0x10] sm:$0xff] %v901_v62  ;;  %v879_v10 = vmul.f32 %v1583_v5, %v859_v60  ;;  %v856_v36 = vadd.f32 0.2548296, %v852_v16  ;;  %v2352_v52 = vpop.eup %1584  ;;  %1588 = vrcp.f32 %v1161_v8  ;;  %v2356_v55 = vmul.f32 0.70710677, %v2345_v9 }
 0x1a5   :  { %v894_v49 = vadd.f32 1.0, %v886_v57  ;;  %v1179_v3 = vadd.f32 1.4214138, %v1175_v27  ;;  %v1168_v14 = vmul.f32 1.0614054, %v2352_v52  ;;  %v1587_v21 = vpop.eup %1586  ;;  %vm804_vm14 = vcmp.ge.f32.partialorder %v2231_v45, 0.0 }
 0x1a6   :  { %v883_v26 = vsub.f32 1.0, %v879_v10  ;;  %v860_v18 = vmul.f32 %v2293_v17, %v856_v36  ;;  %v1211_v30 = vmul.f32 1.442695, %v1207_v7  ;;  %v1154_v6 = vand.u32 2147483647, %v2356_v55 }
 0x1a7   :  { %v898_v28 = vmul.f32 %v894_v49, %v890_v35  ;;  %v1183_v41 = vmul.f32 %v2332_v44, %v1179_v3  ;;  %v1172_v37 = vadd.f32 -1.4531521, %v1168_v14  ;;  %v891_v19 = vmul.f32 0.5, %v2207_v34 }
 0x1a8   :  { %v887_v54 = vmul.f32 %v883_v26, %v807_v20  ;;  %v880_v4 = vmul.f32 %v1587_v21, %v860_v18  ;;  %v1208_v17 = vmul.f32 %v1204_v56, %v2310_v38  ;;  %v1158_v59 = vmul.f32 0.3275911, %v1154_v6 }
 0x1a9   :  { %v902_v22 = vadd.f32 %v898_v28, %v2164_v39  ;;  %v1187_v35 = vadd.f32 -0.28449672, %v1183_v41  ;;  %v1176_v33 = vmul.f32 %v2352_v52, %v1172_v37  ;;  %v808_v12 = vsel %vm804_vm14, 1.0, %v1601_v46 }
 0x1aa   :  { %v895_v48 = vadd.f32 1.0, %v887_v54  ;;  %v884_v43 = vsub.f32 1.0, %v880_v4  ;;  %v2367_v15 = vpop.eup %1588  ;;  %1590 = vpow2.f32 %v1211_v30  ;;  %v1205_v34 = vsub.f32 0.0, %v2330_v40 }
 0x1ab   :  { %906 = vst [vmem:[%s2430_s6 + $0x18] sm:$0xff] %v902_v22  ;;  %v1162_v38 = vadd.f32 1.0, %v1158_v59  ;;  %v1191_v53 = vmul.f32 %v2332_v44, %v1187_v35  ;;  %v1180_v1 = vadd.f32 1.4214138, %v1176_v33  ;;  %v892_v32 = vmul.f32 0.5, %v2210_v31 }
 0x1ac   :  { %v899_v2 = vmul.f32 %v895_v48, %v891_v19  ;;  %v888_v42 = vmul.f32 %v884_v43, %v808_v12  ;;  %v1213_v23 = vmul.f32 1.442695, %v1208_v17  ;;  %v1169_v58 = vmul.f32 1.0614054, %v2367_v15 }
 0x1ad   :  { %1592 = vrcp.f32 %v1162_v38  ;;  %v1195_v45 = vadd.f32 0.2548296, %v1191_v53  ;;  %v1184_v13 = vmul.f32 %v2352_v52, %v1180_v1  ;;  %v1209_v60 = vmul.f32 %v1205_v34, %v2330_v40 }
 0x1ae   :  { %v896_v61 = vadd.f32 1.0, %v888_v42  ;;  %v903_v29 = vadd.f32 %v899_v2, %v2218_v51  ;;  %v1173_v62 = vadd.f32 -1.4531521, %v1169_v58  ;;  %1594 = vpow2.f32 %v1213_v23 }
 0x1af   :  { %v1199_v31 = vmul.f32 %v2332_v44, %v1195_v45  ;;  %v1188_v0 = vadd.f32 -0.28449672, %v1184_v13  ;;  %vm1143_vm15 = vcmp.ge.f32.partialorder %v2280_v24, 0.0  ;;  %v1215_v36 = vmul.f32 1.442695, %v1209_v60 }
 0x1b0   :  { %v900_v16 = vmul.f32 %v896_v61, %v892_v32  ;;  %907 = vst [vmem:[%s2430_s6 + $0x50] sm:$0xff] %v903_v29  ;;  %v1591_v5 = vpop.eup %1590  ;;  %v1177_v57 = vmul.f32 %v2367_v15, %v1173_v62  ;;  %v1206_v27 = vsub.f32 0.0, %v1154_v6  ;;  %v1147_v26 = vsel %vm1143_vm15, 1.0, %v1601_v46 }
 0x1b1   :  { %v1219_v8 = vmul.f32 %v1591_v5, %v1199_v31  ;;  %v1192_v20 = vmul.f32 %v2352_v52, %v1188_v0  ;;  %v1231_v28 = vmul.f32 0.5, %v2267_v47  ;;  %vm1144_vm0 = vcmp.ge.f32.partialorder %v2298_v11, 0.0 }
 0x1b2   :  { %v904_v7 = vadd.f32 %v900_v16, %v2218_v51  ;;  %v1181_v10 = vadd.f32 1.4214138, %v1177_v57  ;;  %v1210_v54 = vmul.f32 %v1206_v27, %v1154_v6  ;;  %1596 = vpow2.f32 %v1215_v36 }
 0x1b3   :  { %v1593_v40 = vpop.eup %1592  ;;  %v1223_v44 = vsub.f32 1.0, %v1219_v8  ;;  %v1196_v49 = vadd.f32 0.2548296, %v1192_v20  ;;  %v1148_v48 = vsel %vm1144_vm0, 1.0, %v1601_v46  ;;  %v1232_v12 = vmul.f32 0.5, %v2283_v63 }
 0x1b4   :  { %908 = vst [vmem:[%s2430_s6 + $0x58] sm:$0xff] %v904_v7  ;;  %v1170_v56 = vmul.f32 1.0614054, %v1593_v40  ;;  %v1185_v18 = vmul.f32 %v2367_v15, %v1181_v10  ;;  %v1595_v21 = vpop.eup %1594  ;;  %v1217_v43 = vmul.f32 1.442695, %v1210_v54  ;;  %vm1145_vm1 = vcmp.ge.f32.partialorder %v2318_v50, 0.0 }
 0x1b5   :  { %v1227_v3 = vmul.f32 %v1223_v44, %v1147_v26  ;;  %v1200_v24 = vmul.f32 %v2352_v52, %v1196_v49  ;;  %v1233_v29 = vmul.f32 0.5, %v2301_v25  ;;  %vm1146_vm2 = vcmp.ge.f32.partialorder %v2356_v55, 0.0 }
 0x1b6   :  { %v1174_v14 = vadd.f32 -1.4531521, %v1170_v56  ;;  %v1189_v30 = vadd.f32 -0.28449672, %v1185_v18  ;;  %1598 = vpow2.f32 %v1217_v43  ;;  %v1150_v60 = vsel %vm1146_vm2, 1.0, %v1601_v46 }
 0x1b7   :  { %v1235_v4 = vadd.f32 1.0, %v1227_v3  ;;  %v1220_v41 = vmul.f32 %v1595_v21, %v1200_v24  ;;  %v1234_v31 = vmul.f32 0.5, %v2345_v9 }
 0x1b8   :  { %v1178_v37 = vmul.f32 %v1593_v40, %v1174_v14  ;;  %v1193_v22 = vmul.f32 %v2367_v15, %v1189_v30  ;;  %v1597_v6 = vpop.eup %1596 }
 0x1b9   :  { %v1239_v19 = vmul.f32 %v1235_v4, %v1231_v28  ;;  %v1224_v17 = vsub.f32 1.0, %v1220_v41 }
 0x1ba   :  { %v1182_v59 = vadd.f32 1.4214138, %v1178_v37  ;;  %v1197_v52 = vadd.f32 0.2548296, %v1193_v22 }
 0x1bb   :  { %v1243_v35 = vadd.f32 %v1239_v19, %v2164_v39  ;;  %v1228_v47 = vmul.f32 %v1224_v17, %v1148_v48 }
 0x1bc   :  { %v1186_v33 = vmul.f32 %v1593_v40, %v1182_v59  ;;  %v1201_v11 = vmul.f32 %v2367_v15, %v1197_v52  ;;  %v1149_v15 = vsel %vm1145_vm1, 1.0, %v1601_v46  ;;  %v1599_v61 = vpop.eup %1598 }
 0x1bd   :  { %1247 = vst [vmem:[%s2430_s6 + $0x30] sm:$0xff] %v1243_v35  ;;  %v1236_v34 = vadd.f32 1.0, %v1228_v47 }
 0x1be   :  { %v1190_v38 = vadd.f32 -0.28449672, %v1186_v33  ;;  %v1221_v2 = vmul.f32 %v1597_v6, %v1201_v11 }
 0x1bf   :  { %v1240_v42 = vmul.f32 %v1236_v34, %v1232_v12 }
 0x1c0   :  { %v1194_v53 = vmul.f32 %v1593_v40, %v1190_v38  ;;  %v1225_v1 = vsub.f32 1.0, %v1221_v2 }
 0x1c1   :  { %v1244_v32 = vadd.f32 %v1240_v42, %v2164_v39 }
 0x1c2   :  { %v1198_v23 = vadd.f32 0.2548296, %v1194_v53  ;;  %v1229_v58 = vmul.f32 %v1225_v1, %v1149_v15 }
 0x1c3   :  { %1248 = vst [vmem:[%s2430_s6 + $0x38] sm:$0xff] %v1244_v32 }
 0x1c4   :  { %v1202_v63 = vmul.f32 %v1593_v40, %v1198_v23  ;;  %v1237_v50 = vadd.f32 1.0, %v1229_v58 }
 0x1c6   :  { %v1222_v45 = vmul.f32 %v1599_v61, %v1202_v63  ;;  %v1241_v13 = vmul.f32 %v1237_v50, %v1233_v29 }
 0x1c8   :  { %v1226_v62 = vsub.f32 1.0, %v1222_v45  ;;  %v1245_v39 = vadd.f32 %v1241_v13, %v2218_v51 }
 0x1ca   :  { %v1230_v16 = vmul.f32 %v1226_v62, %v1150_v60  ;;  %1249 = vst [vmem:[%s2430_s6 + $0x70] sm:$0xff] %v1245_v39 }
 0x1cc   :  { %v1238_v0 = vadd.f32 1.0, %v1230_v16 }
 0x1ce   :  { %v1242_v5 = vmul.f32 %v1238_v0, %v1234_v31 }
 0x1d0   :  { %v1246_v25 = vadd.f32 %v1242_v5, %v2218_v51 }
 0x1d2   :  { %1250 = vst [vmem:[%s2430_s6 + $0x78] sm:$0xff] %v1246_v25 }

</bundles_post_ra>
